<compile_context>
chip_gen: v7x
topology: tpu7x:2x2x1
jax: 0.10.0
libtpu: 0.0.40
codegen_flags: <defaults>
</compile_context>

<pallas_src>
import functools

import jax
import jax.numpy as jnp
from jax import lax
from jax.experimental import pallas as pl
from jax.experimental.pallas import tpu as pltpu


def _round_up(x, m):
    return (x + m - 1) // m * m


def gru_seq_kernel(gx_ref, whh_ref, bhn_ref, h_out_ref, h_ref):
    """One (batch-block, time-block) grid step of the GRU recurrence.

    gx_ref:   (Ts, Bb, 3*Hp)  input-side gate preactivations (r|z|n, lane-aligned)
    whh_ref:  (Hp, 3*Hp)      hidden-to-hidden weights laid out for h @ W
    bhn_ref:  (1, Hp)         hidden bias of the n gate (stays inside r * (...))
    h_out_ref:(Bb, Hp)        final hidden state (written on the last time block)
    h_ref:    (Bb, Hp) f32    VMEM scratch carrying h across time blocks
    """
    Ts, Bb, _ = gx_ref.shape
    Hp = h_out_ref.shape[1]
    t_blk = pl.program_id(1)

    @pl.when(t_blk == 0)
    def _():
        h_ref[...] = jnp.zeros_like(h_ref)

    w_hh = whh_ref[...]                                    # loaded once per grid step
    # Hoisted out of the step loop: JAX does not CSE broadcast_in_dim.
    b_hn = jnp.broadcast_to(bhn_ref[...], (Bb, Hp)).astype(jnp.float32)

    def step(t, h):
        gx = gx_ref[t].astype(jnp.float32)                                 # (Bb, 3Hp)
        gh = jnp.dot(h.astype(w_hh.dtype), w_hh,
                     preferred_element_type=jnp.float32)                   # (Bb, 3Hp)
        r = jax.nn.sigmoid(gx[:, :Hp] + gh[:, :Hp])
        z = jax.nn.sigmoid(gx[:, Hp:2 * Hp] + gh[:, Hp:2 * Hp])
        n = jnp.tanh(gx[:, 2 * Hp:] + r * (gh[:, 2 * Hp:] + b_hn))
        return (1.0 - z) * n + z * h

    # Bounded partial unroll: LLO scheduler visibility without vreg/live-range blowup.
    h = lax.fori_loop(0, Ts, step, h_ref[...], unroll=min(8, Ts))
    h_ref[...] = h

    @pl.when(t_blk == pl.num_programs(1) - 1)
    def _():
        h_out_ref[...] = h.astype(h_out_ref.dtype)


def _choose_time_block(S, Bb, Hp, itemsize, budget_bytes):
    # Dominant live buffer: double-buffered gates_x tile of (Ts, Bb, 3*Hp).
    per_step = 2 * Bb * 3 * Hp * itemsize
    ts = max(1, budget_bytes // max(per_step, 1))
    return int(min(S, ts, 512))


def encoder_rnn_forward(x_tokens, emb_table, w_ih, w_hh, b_ih, b_hh, *,
                        compute_dtype=jnp.bfloat16,
                        time_block=None,
                        vmem_budget_bytes=16 * 1024 * 1024):
    """x_tokens: (B, S) int32 token ids.

    emb_table: (V, H) f32
    w_ih, w_hh: (3H, H) f32 in PyTorch layout (gates stacked r, z, n)
    b_ih, b_hh: (3H,)  f32
    compute_dtype: dtype of gates_x / W_hh fed to the MXU (bf16 recommended);
                   the hidden carry and all elementwise gate math stay in f32
                   (so this is safe on v5e, whose VPU/EUP have no bf16 path).
    Returns hidden of shape (1, B, H) matching nn.GRU's `hidden` output.
    """
    # TODO(synk): nn.Embedding raises on out-of-range token ids; jnp.take clamps
    # silently (semantic difference only, no numeric effect for valid ids).
    B, S = x_tokens.shape
    H = emb_table.shape[1]
    Hp = _round_up(H, 128)   # lane-aligned gate sections
    Bp = _round_up(B, 8)     # sublane-aligned batch

    f32 = jnp.float32
    emb_table = emb_table.astype(f32)
    w_ih, w_hh = w_ih.astype(f32), w_hh.astype(f32)
    b_ih, b_hh = b_ih.astype(f32), b_hh.astype(f32)

    # ---- gate-aligned, padded parameter layout (each gate starts at g*Hp) ----
    # Input-to-hidden weights: (3Hp, H), gate g occupies rows [g*Hp, g*Hp+H).
    w_ih_p = jnp.pad(w_ih.reshape(3, H, H), ((0, 0), (0, Hp - H), (0, 0)))
    w_ih_p = w_ih_p.reshape(3 * Hp, H)
    # Fold r/z hidden biases into the input-side preactivations; b_hn stays inside
    # r * (h @ W_hn^T + b_hn).
    bias_x = b_ih + jnp.concatenate([b_hh[:2 * H], jnp.zeros((H,), f32)])
    bias_x_p = jnp.pad(bias_x.reshape(3, H), ((0, 0), (0, Hp - H))).reshape(3 * Hp)
    # Hidden-to-hidden weights for h @ W: (Hp, 3Hp), whh_p[i, g*Hp + j] = W_hg[j, i].
    w_hh_g = jnp.pad(w_hh.reshape(3, H, H).transpose(0, 2, 1),
                     ((0, 0), (0, Hp - H), (0, Hp - H)))          # (3, Hp_in, Hp_out)
    whh_p = w_hh_g.transpose(1, 0, 2).reshape(Hp, 3 * Hp)
    bhn_p = jnp.pad(b_hh[2 * H:], (0, Hp - H)).reshape(1, Hp)

    # ---- time-parallel pre-pass: time-major gather + ONE big MXU GEMM ----
    emb_t = jnp.take(emb_table, x_tokens.T, axis=0)               # (S, B, H) time-major
    gates_x = (emb_t.reshape(S * B, H) @ w_ih_p.T + bias_x_p).reshape(S, B, 3 * Hp)

    # ---- blocking: batch (parallel, for v7x megacore) and time (arbitrary) ----
    batch_block = Bp // 2 if (Bp >= 16 and (Bp // 2) % 8 == 0) else Bp
    nb = Bp // batch_block

    itemsize = jnp.dtype(compute_dtype).itemsize
    Ts = time_block if time_block is not None else _choose_time_block(
        S, batch_block, Hp, itemsize, vmem_budget_bytes)
    S_pad = _round_up(S, Ts)
    nt = S_pad // Ts

    # Pad batch (sublane) and time. Padded time steps are exact identities:
    # z-gate preactivation = +1e4 -> sigmoid == 1.0 -> h_new == h.
    gx = jnp.zeros((S_pad, Bp, 3 * Hp), f32)
    gx = gx.at[:S, :B].set(gates_x)
    if S_pad > S:
        gx = gx.at[S:, :, Hp:2 * Hp].set(1e4)
    gx = gx.astype(compute_dtype)
    whh_c = whh_p.astype(compute_dtype)

    out = pl.pallas_call(
        gru_seq_kernel,
        out_shape=jax.ShapeDtypeStruct((Bp, Hp), f32),
        grid_spec=pltpu.PrefetchScalarGridSpec(
            num_scalar_prefetch=0,
            grid=(nb, nt),
            in_specs=[
                # gates_x streamed tile-by-tile along time; double-buffered by Pallas.
                pl.BlockSpec((Ts, batch_block, 3 * Hp), lambda b, t: (t, b, 0)),
                # W_hh / b_hn: same block every step -> fetched once, stays resident.
                pl.BlockSpec((Hp, 3 * Hp), lambda b, t: (0, 0)),
                pl.BlockSpec((1, Hp), lambda b, t: (0, 0)),
            ],
            out_specs=pl.BlockSpec((batch_block, Hp), lambda b, t: (b, 0)),
            scratch_shapes=[pltpu.VMEM((batch_block, Hp), f32)],
        ),
        compiler_params=pltpu.CompilerParams(
            dimension_semantics=("parallel", "arbitrary"),
            # Explicit limit: keeps 2-deep pipelining alive and stays well under
            # v7x's 64 MiB physical VMEM (Ts is sized against vmem_budget_bytes).
            vmem_limit_bytes=32 * 1024 * 1024,
        ),
    )(gx, whh_c, bhn_p)

    return out[None, :B, :H]                                      # (1, B, H)


def _reference_gru(x_tokens, emb_table, w_ih, w_hh, b_ih, b_hh):
    """Pure-JAX reference matching torch.nn.GRU semantics (gate order r, z, n)."""
    B, S = x_tokens.shape
    H = emb_table.shape[1]
    emb = jnp.take(emb_table, x_tokens, axis=0)  # (B, S, H)
    w_ir, w_iz, w_in = w_ih[:H], w_ih[H:2 * H], w_ih[2 * H:]
    w_hr, w_hz, w_hn = w_hh[:H], w_hh[H:2 * H], w_hh[2 * H:]
    b_ir, b_iz, b_in = b_ih[:H], b_ih[H:2 * H], b_ih[2 * H:]
    b_hr, b_hz, b_hn = b_hh[:H], b_hh[H:2 * H], b_hh[2 * H:]

    h = jnp.zeros((B, H), jnp.float32)
    for t in range(S):
        x_t = emb[:, t, :]
        r = jax.nn.sigmoid(x_t @ w_ir.T + b_ir + h @ w_hr.T + b_hr)
        z = jax.nn.sigmoid(x_t @ w_iz.T + b_iz + h @ w_hz.T + b_hz)
        n = jnp.tanh(x_t @ w_in.T + b_in + r * (h @ w_hn.T + b_hn))
        h = (1.0 - z) * n + z * h
    return h[None, :, :]


if __name__ == "__main__":
    H, V = 32, 16
    key = jax.random.PRNGKey(0)
    k_tok, k_tok2, k_emb, k_wih, k_whh, k_bih, k_bhh = jax.random.split(key, 7)

    bound = 1.0 / (H ** 0.5)
    emb_table = jax.random.normal(k_emb, (V, H), jnp.float32)
    w_ih = jax.random.uniform(k_wih, (3 * H, H), jnp.float32, -bound, bound)
    w_hh = jax.random.uniform(k_whh, (3 * H, H), jnp.float32, -bound, bound)
    b_ih = jax.random.uniform(k_bih, (3 * H,), jnp.float32, -bound, bound)
    b_hh = jax.random.uniform(k_bhh, (3 * H,), jnp.float32, -bound, bound)

    # ---- config 1: module-sized shapes (B=2, S=8) ----
    B, S = 2, 8
    x_tokens = jax.random.randint(k_tok, (B, S), 0, V, dtype=jnp.int32)
    ref = _reference_gru(x_tokens, emb_table, w_ih, w_hh, b_ih, b_hh)

    # f32 path: numerically tight vs reference.
    hid_f32 = encoder_rnn_forward(x_tokens, emb_table, w_ih, w_hh, b_ih, b_hh,
                                  compute_dtype=jnp.float32)
    hid_f32 = jax.block_until_ready(hid_f32)
    assert hid_f32.shape == (1, B, H), hid_f32.shape
    assert jnp.allclose(hid_f32, ref, atol=3e-5, rtol=1e-4), (
        float(jnp.max(jnp.abs(hid_f32 - ref))))

    # bf16 path (default / perf config): looser tolerance for bf16 gates + weights.
    hid_bf16 = encoder_rnn_forward(x_tokens, emb_table, w_ih, w_hh, b_ih, b_hh,
                                   compute_dtype=jnp.bfloat16)
    hid_bf16 = jax.block_until_ready(hid_bf16)
    assert hid_bf16.shape == (1, B, H), hid_bf16.shape
    assert jnp.allclose(hid_bf16, ref, atol=5e-2, rtol=0.0), (
        float(jnp.max(jnp.abs(hid_bf16 - ref))))

    # ---- config 2: exercises time-blocking (S not a multiple of Ts), the carried
    # scratch across time blocks, and the parallel batch axis (nb=2). ----
    B2, S2 = 16, 10
    x_tokens2 = jax.random.randint(k_tok2, (B2, S2), 0, V, dtype=jnp.int32)
    ref2 = _reference_gru(x_tokens2, emb_table, w_ih, w_hh, b_ih, b_hh)
    hid2 = encoder_rnn_forward(x_tokens2, emb_table, w_ih, w_hh, b_ih, b_hh,
                               compute_dtype=jnp.float32, time_block=4)
    hid2 = jax.block_until_ready(hid2)
    assert hid2.shape == (1, B2, H), hid2.shape
    assert jnp.allclose(hid2, ref2, atol=3e-5, rtol=1e-4), (
        float(jnp.max(jnp.abs(hid2 - ref2))))

    print("KERNEL_OK")
</pallas_src>

<mosaic_0001>
module attributes {stable_mosaic.version = 11 : i64} {
  func.func @gru_seq_kernel(%arg0: i32, %arg1: i32, %arg2: memref<8x8x384xf32, #tpu.memory_space<vmem>>, %arg3: memref<128x384xf32, #tpu.memory_space<vmem>>, %arg4: memref<1x128xf32, #tpu.memory_space<vmem>>, %arg5: memref<8x128xf32, #tpu.memory_space<vmem>>, %arg6: memref<8x128xf32, #tpu.memory_space<vmem>>) attributes {dimension_semantics = [#tpu.dimension_semantics<parallel>, #tpu.dimension_semantics<arbitrary>], iteration_bounds = array<i64: 1, 1>, scalar_prefetch = 0 : i64, scratch_operands = 1 : i64, tpu.core_type = #tpu.core_type<tc>, window_params = [{transform_indices = @transform_0, window_bounds = array<i64: 8, 8, 384>}, {pipeline_mode = #tpu.pipeline_mode<synchronous>, transform_indices = @transform_1, window_bounds = array<i64: 128, 384>}, {pipeline_mode = #tpu.pipeline_mode<synchronous>, transform_indices = @transform_2, window_bounds = array<i64: 1, 128>}, {transform_indices = @transform_3, window_bounds = array<i64: 8, 128>}]} {
    %c0_i32 = arith.constant 0 : i32
    %0 = arith.cmpi eq, %arg1, %c0_i32 : i32
    %1 = arith.extui %0 : i1 to i32
    %c0_i32_0 = arith.constant 0 : i32
    %2 = arith.cmpi ne, %1, %c0_i32_0 : i32
    scf.if %2 {
      %cst_58 = arith.constant 0.000000e+00 : f32
      %260 = vector.broadcast %cst_58 : f32 to vector<8x128xf32>
      %c0_59 = arith.constant 0 : index
      %c0_60 = arith.constant 0 : index
      %261 = vector.load %arg6[%c0_59, %c0_60] : memref<8x128xf32, #tpu.memory_space<vmem>>, vector<8x128xf32>
      tpu.vector_store %arg6[%c0_59, %c0_60], %260 {strides = array<i32>} : memref<8x128xf32, #tpu.memory_space<vmem>>, vector<8x128xf32>,
    } else {
    }
    %c0 = arith.constant 0 : index
    %c0_1 = arith.constant 0 : index
    %3 = vector.load %arg3[%c0, %c0_1] : memref<128x384xf32, #tpu.memory_space<vmem>>, vector<128x384xf32>
    %c0_2 = arith.constant 0 : index
    %c0_3 = arith.constant 0 : index
    %4 = vector.load %arg4[%c0_2, %c0_3] : memref<1x128xf32, #tpu.memory_space<vmem>>, vector<1x128xf32>
    %5 = vector.shape_cast %4 : vector<1x128xf32> to vector<1x128xf32>
    %6 = vector.broadcast %5 : vector<1x128xf32> to vector<8x128xf32>
    %c0_4 = arith.constant 0 : index
    %c0_5 = arith.constant 0 : index
    %7 = vector.load %arg6[%c0_4, %c0_5] : memref<8x128xf32, #tpu.memory_space<vmem>>, vector<8x128xf32>
    %c0_i32_6 = arith.constant 0 : i32
    %8 = arith.index_cast %c0_i32_6 : i32 to index
    %c0_7 = arith.constant 0 : index
    %c0_8 = arith.constant 0 : index
    %9 = vector.load %arg2[%8, %c0_7, %c0_8] : memref<8x8x384xf32, #tpu.memory_space<vmem>>, vector<1x8x384xf32>
    %10 = vector.shape_cast %9 : vector<1x8x384xf32> to vector<8x384xf32>
    %cst = arith.constant dense<0.000000e+00> : vector<8x384xf32>
    %11 = tpu.matmul %7, %3, %cst {dimension_numbers = #tpu.dot_dimension_numbers<[1], [0], [0], [1], [0, 0, 1, 1], [], []>} : vector<8x128xf32>, vector<128x384xf32>, vector<8x384xf32> -> vector<8x384xf32>
    %12 = vector.extract_strided_slice %10 {offsets = [0, 0], sizes = [8, 128], strides = [1, 1]} : vector<8x384xf32> to vector<8x128xf32>
    %13 = vector.extract_strided_slice %11 {offsets = [0, 0], sizes = [8, 128], strides = [1, 1]} : vector<8x384xf32> to vector<8x128xf32>
    %14 = arith.addf %12, %13 : vector<8x128xf32>
    %15 = arith.negf %14 : vector<8x128xf32>
    %16 = math.exp %15 : vector<8x128xf32>
    %cst_9 = arith.constant 1.000000e+00 : f32
    %17 = vector.broadcast %cst_9 : f32 to vector<8x128xf32>
    %18 = arith.addf %17, %16 : vector<8x128xf32>
    %19 = arith.divf %17, %18 : vector<8x128xf32>
    %20 = vector.extract_strided_slice %10 {offsets = [0, 128], sizes = [8, 128], strides = [1, 1]} : vector<8x384xf32> to vector<8x128xf32>
    %21 = vector.extract_strided_slice %11 {offsets = [0, 128], sizes = [8, 128], strides = [1, 1]} : vector<8x384xf32> to vector<8x128xf32>
    %22 = arith.addf %20, %21 : vector<8x128xf32>
    %23 = arith.negf %22 : vector<8x128xf32>
    %24 = math.exp %23 : vector<8x128xf32>
    %cst_10 = arith.constant 1.000000e+00 : f32
    %25 = vector.broadcast %cst_10 : f32 to vector<8x128xf32>
    %26 = arith.addf %25, %24 : vector<8x128xf32>
    %27 = arith.divf %25, %26 : vector<8x128xf32>
    %28 = vector.extract_strided_slice %10 {offsets = [0, 256], sizes = [8, 128], strides = [1, 1]} : vector<8x384xf32> to vector<8x128xf32>
    %29 = vector.extract_strided_slice %11 {offsets = [0, 256], sizes = [8, 128], strides = [1, 1]} : vector<8x384xf32> to vector<8x128xf32>
    %30 = arith.addf %29, %6 : vector<8x128xf32>
    %31 = arith.mulf %19, %30 : vector<8x128xf32>
    %32 = arith.addf %28, %31 : vector<8x128xf32>
    %33 = math.tanh %32 : vector<8x128xf32>
    %cst_11 = arith.constant 1.000000e+00 : f32
    %34 = vector.broadcast %cst_11 : f32 to vector<8x128xf32>
    %35 = arith.subf %34, %27 : vector<8x128xf32>
    %36 = arith.mulf %35, %33 : vector<8x128xf32>
    %37 = arith.mulf %27, %7 : vector<8x128xf32>
    %38 = arith.addf %36, %37 : vector<8x128xf32>
    %c1_i32 = arith.constant 1 : i32
    %39 = arith.index_cast %c1_i32 : i32 to index
    %c0_12 = arith.constant 0 : index
    %c0_13 = arith.constant 0 : index
    %40 = vector.load %arg2[%39, %c0_12, %c0_13] : memref<8x8x384xf32, #tpu.memory_space<vmem>>, vector<1x8x384xf32>
    %41 = vector.shape_cast %40 : vector<1x8x384xf32> to vector<8x384xf32>
    %cst_14 = arith.constant dense<0.000000e+00> : vector<8x384xf32>
    %42 = tpu.matmul %38, %3, %cst_14 {dimension_numbers = #tpu.dot_dimension_numbers<[1], [0], [0], [1], [0, 0, 1, 1], [], []>} : vector<8x128xf32>, vector<128x384xf32>, vector<8x384xf32> -> vector<8x384xf32>
    %43 = vector.extract_strided_slice %41 {offsets = [0, 0], sizes = [8, 128], strides = [1, 1]} : vector<8x384xf32> to vector<8x128xf32>
    %44 = vector.extract_strided_slice %42 {offsets = [0, 0], sizes = [8, 128], strides = [1, 1]} : vector<8x384xf32> to vector<8x128xf32>
    %45 = arith.addf %43, %44 : vector<8x128xf32>
    %46 = arith.negf %45 : vector<8x128xf32>
    %47 = math.exp %46 : vector<8x128xf32>
    %cst_15 = arith.constant 1.000000e+00 : f32
    %48 = vector.broadcast %cst_15 : f32 to vector<8x128xf32>
    %49 = arith.addf %48, %47 : vector<8x128xf32>
    %50 = arith.divf %48, %49 : vector<8x128xf32>
    %51 = vector.extract_strided_slice %41 {offsets = [0, 128], sizes = [8, 128], strides = [1, 1]} : vector<8x384xf32> to vector<8x128xf32>
    %52 = vector.extract_strided_slice %42 {offsets = [0, 128], sizes = [8, 128], strides = [1, 1]} : vector<8x384xf32> to vector<8x128xf32>
    %53 = arith.addf %51, %52 : vector<8x128xf32>
    %54 = arith.negf %53 : vector<8x128xf32>
    %55 = math.exp %54 : vector<8x128xf32>
    %cst_16 = arith.constant 1.000000e+00 : f32
    %56 = vector.broadcast %cst_16 : f32 to vector<8x128xf32>
    %57 = arith.addf %56, %55 : vector<8x128xf32>
    %58 = arith.divf %56, %57 : vector<8x128xf32>
    %59 = vector.extract_strided_slice %41 {offsets = [0, 256], sizes = [8, 128], strides = [1, 1]} : vector<8x384xf32> to vector<8x128xf32>
    %60 = vector.extract_strided_slice %42 {offsets = [0, 256], sizes = [8, 128], strides = [1, 1]} : vector<8x384xf32> to vector<8x128xf32>
    %61 = arith.addf %60, %6 : vector<8x128xf32>
    %62 = arith.mulf %50, %61 : vector<8x128xf32>
    %63 = arith.addf %59, %62 : vector<8x128xf32>
    %64 = math.tanh %63 : vector<8x128xf32>
    %cst_17 = arith.constant 1.000000e+00 : f32
    %65 = vector.broadcast %cst_17 : f32 to vector<8x128xf32>
    %66 = arith.subf %65, %58 : vector<8x128xf32>
    %67 = arith.mulf %66, %64 : vector<8x128xf32>
    %68 = arith.mulf %58, %38 : vector<8x128xf32>
    %69 = arith.addf %67, %68 : vector<8x128xf32>
    %c2_i32 = arith.constant 2 : i32
    %70 = arith.index_cast %c2_i32 : i32 to index
    %c0_18 = arith.constant 0 : index
    %c0_19 = arith.constant 0 : index
    %71 = vector.load %arg2[%70, %c0_18, %c0_19] : memref<8x8x384xf32, #tpu.memory_space<vmem>>, vector<1x8x384xf32>
    %72 = vector.shape_cast %71 : vector<1x8x384xf32> to vector<8x384xf32>
    %cst_20 = arith.constant dense<0.000000e+00> : vector<8x384xf32>
    %73 = tpu.matmul %69, %3, %cst_20 {dimension_numbers = #tpu.dot_dimension_numbers<[1], [0], [0], [1], [0, 0, 1, 1], [], []>} : vector<8x128xf32>, vector<128x384xf32>, vector<8x384xf32> -> vector<8x384xf32>
    %74 = vector.extract_strided_slice %72 {offsets = [0, 0], sizes = [8, 128], strides = [1, 1]} : vector<8x384xf32> to vector<8x128xf32>
    %75 = vector.extract_strided_slice %73 {offsets = [0, 0], sizes = [8, 128], strides = [1, 1]} : vector<8x384xf32> to vector<8x128xf32>
    %76 = arith.addf %74, %75 : vector<8x128xf32>
    %77 = arith.negf %76 : vector<8x128xf32>
    %78 = math.exp %77 : vector<8x128xf32>
    %cst_21 = arith.constant 1.000000e+00 : f32
    %79 = vector.broadcast %cst_21 : f32 to vector<8x128xf32>
    %80 = arith.addf %79, %78 : vector<8x128xf32>
    %81 = arith.divf %79, %80 : vector<8x128xf32>
    %82 = vector.extract_strided_slice %72 {offsets = [0, 128], sizes = [8, 128], strides = [1, 1]} : vector<8x384xf32> to vector<8x128xf32>
    %83 = vector.extract_strided_slice %73 {offsets = [0, 128], sizes = [8, 128], strides = [1, 1]} : vector<8x384xf32> to vector<8x128xf32>
    %84 = arith.addf %82, %83 : vector<8x128xf32>
    %85 = arith.negf %84 : vector<8x128xf32>
    %86 = math.exp %85 : vector<8x128xf32>
    %cst_22 = arith.constant 1.000000e+00 : f32
    %87 = vector.broadcast %cst_22 : f32 to vector<8x128xf32>
    %88 = arith.addf %87, %86 : vector<8x128xf32>
    %89 = arith.divf %87, %88 : vector<8x128xf32>
    %90 = vector.extract_strided_slice %72 {offsets = [0, 256], sizes = [8, 128], strides = [1, 1]} : vector<8x384xf32> to vector<8x128xf32>
    %91 = vector.extract_strided_slice %73 {offsets = [0, 256], sizes = [8, 128], strides = [1, 1]} : vector<8x384xf32> to vector<8x128xf32>
    %92 = arith.addf %91, %6 : vector<8x128xf32>
    %93 = arith.mulf %81, %92 : vector<8x128xf32>
    %94 = arith.addf %90, %93 : vector<8x128xf32>
    %95 = math.tanh %94 : vector<8x128xf32>
    %cst_23 = arith.constant 1.000000e+00 : f32
    %96 = vector.broadcast %cst_23 : f32 to vector<8x128xf32>
    %97 = arith.subf %96, %89 : vector<8x128xf32>
    %98 = arith.mulf %97, %95 : vector<8x128xf32>
    %99 = arith.mulf %89, %69 : vector<8x128xf32>
    %100 = arith.addf %98, %99 : vector<8x128xf32>
    %c3_i32 = arith.constant 3 : i32
    %101 = arith.index_cast %c3_i32 : i32 to index
    %c0_24 = arith.constant 0 : index
    %c0_25 = arith.constant 0 : index
    %102 = vector.load %arg2[%101, %c0_24, %c0_25] : memref<8x8x384xf32, #tpu.memory_space<vmem>>, vector<1x8x384xf32>
    %103 = vector.shape_cast %102 : vector<1x8x384xf32> to vector<8x384xf32>
    %cst_26 = arith.constant dense<0.000000e+00> : vector<8x384xf32>
    %104 = tpu.matmul %100, %3, %cst_26 {dimension_numbers = #tpu.dot_dimension_numbers<[1], [0], [0], [1], [0, 0, 1, 1], [], []>} : vector<8x128xf32>, vector<128x384xf32>, vector<8x384xf32> -> vector<8x384xf32>
    %105 = vector.extract_strided_slice %103 {offsets = [0, 0], sizes = [8, 128], strides = [1, 1]} : vector<8x384xf32> to vector<8x128xf32>
    %106 = vector.extract_strided_slice %104 {offsets = [0, 0], sizes = [8, 128], strides = [1, 1]} : vector<8x384xf32> to vector<8x128xf32>
    %107 = arith.addf %105, %106 : vector<8x128xf32>
    %108 = arith.negf %107 : vector<8x128xf32>
    %109 = math.exp %108 : vector<8x128xf32>
    %cst_27 = arith.constant 1.000000e+00 : f32
    %110 = vector.broadcast %cst_27 : f32 to vector<8x128xf32>
    %111 = arith.addf %110, %109 : vector<8x128xf32>
    %112 = arith.divf %110, %111 : vector<8x128xf32>
    %113 = vector.extract_strided_slice %103 {offsets = [0, 128], sizes = [8, 128], strides = [1, 1]} : vector<8x384xf32> to vector<8x128xf32>
    %114 = vector.extract_strided_slice %104 {offsets = [0, 128], sizes = [8, 128], strides = [1, 1]} : vector<8x384xf32> to vector<8x128xf32>
    %115 = arith.addf %113, %114 : vector<8x128xf32>
    %116 = arith.negf %115 : vector<8x128xf32>
    %117 = math.exp %116 : vector<8x128xf32>
    %cst_28 = arith.constant 1.000000e+00 : f32
    %118 = vector.broadcast %cst_28 : f32 to vector<8x128xf32>
    %119 = arith.addf %118, %117 : vector<8x128xf32>
    %120 = arith.divf %118, %119 : vector<8x128xf32>
    %121 = vector.extract_strided_slice %103 {offsets = [0, 256], sizes = [8, 128], strides = [1, 1]} : vector<8x384xf32> to vector<8x128xf32>
    %122 = vector.extract_strided_slice %104 {offsets = [0, 256], sizes = [8, 128], strides = [1, 1]} : vector<8x384xf32> to vector<8x128xf32>
    %123 = arith.addf %122, %6 : vector<8x128xf32>
    %124 = arith.mulf %112, %123 : vector<8x128xf32>
    %125 = arith.addf %121, %124 : vector<8x128xf32>
    %126 = math.tanh %125 : vector<8x128xf32>
    %cst_29 = arith.constant 1.000000e+00 : f32
    %127 = vector.broadcast %cst_29 : f32 to vector<8x128xf32>
    %128 = arith.subf %127, %120 : vector<8x128xf32>
    %129 = arith.mulf %128, %126 : vector<8x128xf32>
    %130 = arith.mulf %120, %100 : vector<8x128xf32>
    %131 = arith.addf %129, %130 : vector<8x128xf32>
    %c4_i32 = arith.constant 4 : i32
    %132 = arith.index_cast %c4_i32 : i32 to index
    %c0_30 = arith.constant 0 : index
    %c0_31 = arith.constant 0 : index
    %133 = vector.load %arg2[%132, %c0_30, %c0_31] : memref<8x8x384xf32, #tpu.memory_space<vmem>>, vector<1x8x384xf32>
    %134 = vector.shape_cast %133 : vector<1x8x384xf32> to vector<8x384xf32>
    %cst_32 = arith.constant dense<0.000000e+00> : vector<8x384xf32>
    %135 = tpu.matmul %131, %3, %cst_32 {dimension_numbers = #tpu.dot_dimension_numbers<[1], [0], [0], [1], [0, 0, 1, 1], [], []>} : vector<8x128xf32>, vector<128x384xf32>, vector<8x384xf32> -> vector<8x384xf32>
    %136 = vector.extract_strided_slice %134 {offsets = [0, 0], sizes = [8, 128], strides = [1, 1]} : vector<8x384xf32> to vector<8x128xf32>
    %137 = vector.extract_strided_slice %135 {offsets = [0, 0], sizes = [8, 128], strides = [1, 1]} : vector<8x384xf32> to vector<8x128xf32>
    %138 = arith.addf %136, %137 : vector<8x128xf32>
    %139 = arith.negf %138 : vector<8x128xf32>
    %140 = math.exp %139 : vector<8x128xf32>
    %cst_33 = arith.constant 1.000000e+00 : f32
    %141 = vector.broadcast %cst_33 : f32 to vector<8x128xf32>
    %142 = arith.addf %141, %140 : vector<8x128xf32>
    %143 = arith.divf %141, %142 : vector<8x128xf32>
    %144 = vector.extract_strided_slice %134 {offsets = [0, 128], sizes = [8, 128], strides = [1, 1]} : vector<8x384xf32> to vector<8x128xf32>
    %145 = vector.extract_strided_slice %135 {offsets = [0, 128], sizes = [8, 128], strides = [1, 1]} : vector<8x384xf32> to vector<8x128xf32>
    %146 = arith.addf %144, %145 : vector<8x128xf32>
    %147 = arith.negf %146 : vector<8x128xf32>
    %148 = math.exp %147 : vector<8x128xf32>
    %cst_34 = arith.constant 1.000000e+00 : f32
    %149 = vector.broadcast %cst_34 : f32 to vector<8x128xf32>
    %150 = arith.addf %149, %148 : vector<8x128xf32>
    %151 = arith.divf %149, %150 : vector<8x128xf32>
    %152 = vector.extract_strided_slice %134 {offsets = [0, 256], sizes = [8, 128], strides = [1, 1]} : vector<8x384xf32> to vector<8x128xf32>
    %153 = vector.extract_strided_slice %135 {offsets = [0, 256], sizes = [8, 128], strides = [1, 1]} : vector<8x384xf32> to vector<8x128xf32>
    %154 = arith.addf %153, %6 : vector<8x128xf32>
    %155 = arith.mulf %143, %154 : vector<8x128xf32>
    %156 = arith.addf %152, %155 : vector<8x128xf32>
    %157 = math.tanh %156 : vector<8x128xf32>
    %cst_35 = arith.constant 1.000000e+00 : f32
    %158 = vector.broadcast %cst_35 : f32 to vector<8x128xf32>
    %159 = arith.subf %158, %151 : vector<8x128xf32>
    %160 = arith.mulf %159, %157 : vector<8x128xf32>
    %161 = arith.mulf %151, %131 : vector<8x128xf32>
    %162 = arith.addf %160, %161 : vector<8x128xf32>
    %c5_i32 = arith.constant 5 : i32
    %163 = arith.index_cast %c5_i32 : i32 to index
    %c0_36 = arith.constant 0 : index
    %c0_37 = arith.constant 0 : index
    %164 = vector.load %arg2[%163, %c0_36, %c0_37] : memref<8x8x384xf32, #tpu.memory_space<vmem>>, vector<1x8x384xf32>
    %165 = vector.shape_cast %164 : vector<1x8x384xf32> to vector<8x384xf32>
    %cst_38 = arith.constant dense<0.000000e+00> : vector<8x384xf32>
    %166 = tpu.matmul %162, %3, %cst_38 {dimension_numbers = #tpu.dot_dimension_numbers<[1], [0], [0], [1], [0, 0, 1, 1], [], []>} : vector<8x128xf32>, vector<128x384xf32>, vector<8x384xf32> -> vector<8x384xf32>
    %167 = vector.extract_strided_slice %165 {offsets = [0, 0], sizes = [8, 128], strides = [1, 1]} : vector<8x384xf32> to vector<8x128xf32>
    %168 = vector.extract_strided_slice %166 {offsets = [0, 0], sizes = [8, 128], strides = [1, 1]} : vector<8x384xf32> to vector<8x128xf32>
    %169 = arith.addf %167, %168 : vector<8x128xf32>
    %170 = arith.negf %169 : vector<8x128xf32>
    %171 = math.exp %170 : vector<8x128xf32>
    %cst_39 = arith.constant 1.000000e+00 : f32
    %172 = vector.broadcast %cst_39 : f32 to vector<8x128xf32>
    %173 = arith.addf %172, %171 : vector<8x128xf32>
    %174 = arith.divf %172, %173 : vector<8x128xf32>
    %175 = vector.extract_strided_slice %165 {offsets = [0, 128], sizes = [8, 128], strides = [1, 1]} : vector<8x384xf32> to vector<8x128xf32>
    %176 = vector.extract_strided_slice %166 {offsets = [0, 128], sizes = [8, 128], strides = [1, 1]} : vector<8x384xf32> to vector<8x128xf32>
    %177 = arith.addf %175, %176 : vector<8x128xf32>
    %178 = arith.negf %177 : vector<8x128xf32>
    %179 = math.exp %178 : vector<8x128xf32>
    %cst_40 = arith.constant 1.000000e+00 : f32
    %180 = vector.broadcast %cst_40 : f32 to vector<8x128xf32>
    %181 = arith.addf %180, %179 : vector<8x128xf32>
    %182 = arith.divf %180, %181 : vector<8x128xf32>
    %183 = vector.extract_strided_slice %165 {offsets = [0, 256], sizes = [8, 128], strides = [1, 1]} : vector<8x384xf32> to vector<8x128xf32>
    %184 = vector.extract_strided_slice %166 {offsets = [0, 256], sizes = [8, 128], strides = [1, 1]} : vector<8x384xf32> to vector<8x128xf32>
    %185 = arith.addf %184, %6 : vector<8x128xf32>
    %186 = arith.mulf %174, %185 : vector<8x128xf32>
    %187 = arith.addf %183, %186 : vector<8x128xf32>
    %188 = math.tanh %187 : vector<8x128xf32>
    %cst_41 = arith.constant 1.000000e+00 : f32
    %189 = vector.broadcast %cst_41 : f32 to vector<8x128xf32>
    %190 = arith.subf %189, %182 : vector<8x128xf32>
    %191 = arith.mulf %190, %188 : vector<8x128xf32>
    %192 = arith.mulf %182, %162 : vector<8x128xf32>
    %193 = arith.addf %191, %192 : vector<8x128xf32>
    %c6_i32 = arith.constant 6 : i32
    %194 = arith.index_cast %c6_i32 : i32 to index
    %c0_42 = arith.constant 0 : index
    %c0_43 = arith.constant 0 : index
    %195 = vector.load %arg2[%194, %c0_42, %c0_43] : memref<8x8x384xf32, #tpu.memory_space<vmem>>, vector<1x8x384xf32>
    %196 = vector.shape_cast %195 : vector<1x8x384xf32> to vector<8x384xf32>
    %cst_44 = arith.constant dense<0.000000e+00> : vector<8x384xf32>
    %197 = tpu.matmul %193, %3, %cst_44 {dimension_numbers = #tpu.dot_dimension_numbers<[1], [0], [0], [1], [0, 0, 1, 1], [], []>} : vector<8x128xf32>, vector<128x384xf32>, vector<8x384xf32> -> vector<8x384xf32>
    %198 = vector.extract_strided_slice %196 {offsets = [0, 0], sizes = [8, 128], strides = [1, 1]} : vector<8x384xf32> to vector<8x128xf32>
    %199 = vector.extract_strided_slice %197 {offsets = [0, 0], sizes = [8, 128], strides = [1, 1]} : vector<8x384xf32> to vector<8x128xf32>
    %200 = arith.addf %198, %199 : vector<8x128xf32>
    %201 = arith.negf %200 : vector<8x128xf32>
    %202 = math.exp %201 : vector<8x128xf32>
    %cst_45 = arith.constant 1.000000e+00 : f32
    %203 = vector.broadcast %cst_45 : f32 to vector<8x128xf32>
    %204 = arith.addf %203, %202 : vector<8x128xf32>
    %205 = arith.divf %203, %204 : vector<8x128xf32>
    %206 = vector.extract_strided_slice %196 {offsets = [0, 128], sizes = [8, 128], strides = [1, 1]} : vector<8x384xf32> to vector<8x128xf32>
    %207 = vector.extract_strided_slice %197 {offsets = [0, 128], sizes = [8, 128], strides = [1, 1]} : vector<8x384xf32> to vector<8x128xf32>
    %208 = arith.addf %206, %207 : vector<8x128xf32>
    %209 = arith.negf %208 : vector<8x128xf32>
    %210 = math.exp %209 : vector<8x128xf32>
    %cst_46 = arith.constant 1.000000e+00 : f32
    %211 = vector.broadcast %cst_46 : f32 to vector<8x128xf32>
    %212 = arith.addf %211, %210 : vector<8x128xf32>
    %213 = arith.divf %211, %212 : vector<8x128xf32>
    %214 = vector.extract_strided_slice %196 {offsets = [0, 256], sizes = [8, 128], strides = [1, 1]} : vector<8x384xf32> to vector<8x128xf32>
    %215 = vector.extract_strided_slice %197 {offsets = [0, 256], sizes = [8, 128], strides = [1, 1]} : vector<8x384xf32> to vector<8x128xf32>
    %216 = arith.addf %215, %6 : vector<8x128xf32>
    %217 = arith.mulf %205, %216 : vector<8x128xf32>
    %218 = arith.addf %214, %217 : vector<8x128xf32>
    %219 = math.tanh %218 : vector<8x128xf32>
    %cst_47 = arith.constant 1.000000e+00 : f32
    %220 = vector.broadcast %cst_47 : f32 to vector<8x128xf32>
    %221 = arith.subf %220, %213 : vector<8x128xf32>
    %222 = arith.mulf %221, %219 : vector<8x128xf32>
    %223 = arith.mulf %213, %193 : vector<8x128xf32>
    %224 = arith.addf %222, %223 : vector<8x128xf32>
    %c7_i32 = arith.constant 7 : i32
    %225 = arith.index_cast %c7_i32 : i32 to index
    %c0_48 = arith.constant 0 : index
    %c0_49 = arith.constant 0 : index
    %226 = vector.load %arg2[%225, %c0_48, %c0_49] : memref<8x8x384xf32, #tpu.memory_space<vmem>>, vector<1x8x384xf32>
    %227 = vector.shape_cast %226 : vector<1x8x384xf32> to vector<8x384xf32>
    %cst_50 = arith.constant dense<0.000000e+00> : vector<8x384xf32>
    %228 = tpu.matmul %224, %3, %cst_50 {dimension_numbers = #tpu.dot_dimension_numbers<[1], [0], [0], [1], [0, 0, 1, 1], [], []>} : vector<8x128xf32>, vector<128x384xf32>, vector<8x384xf32> -> vector<8x384xf32>
    %229 = vector.extract_strided_slice %227 {offsets = [0, 0], sizes = [8, 128], strides = [1, 1]} : vector<8x384xf32> to vector<8x128xf32>
    %230 = vector.extract_strided_slice %228 {offsets = [0, 0], sizes = [8, 128], strides = [1, 1]} : vector<8x384xf32> to vector<8x128xf32>
    %231 = arith.addf %229, %230 : vector<8x128xf32>
    %232 = arith.negf %231 : vector<8x128xf32>
    %233 = math.exp %232 : vector<8x128xf32>
    %cst_51 = arith.constant 1.000000e+00 : f32
    %234 = vector.broadcast %cst_51 : f32 to vector<8x128xf32>
    %235 = arith.addf %234, %233 : vector<8x128xf32>
    %236 = arith.divf %234, %235 : vector<8x128xf32>
    %237 = vector.extract_strided_slice %227 {offsets = [0, 128], sizes = [8, 128], strides = [1, 1]} : vector<8x384xf32> to vector<8x128xf32>
    %238 = vector.extract_strided_slice %228 {offsets = [0, 128], sizes = [8, 128], strides = [1, 1]} : vector<8x384xf32> to vector<8x128xf32>
    %239 = arith.addf %237, %238 : vector<8x128xf32>
    %240 = arith.negf %239 : vector<8x128xf32>
    %241 = math.exp %240 : vector<8x128xf32>
    %cst_52 = arith.constant 1.000000e+00 : f32
    %242 = vector.broadcast %cst_52 : f32 to vector<8x128xf32>
    %243 = arith.addf %242, %241 : vector<8x128xf32>
    %244 = arith.divf %242, %243 : vector<8x128xf32>
    %245 = vector.extract_strided_slice %227 {offsets = [0, 256], sizes = [8, 128], strides = [1, 1]} : vector<8x384xf32> to vector<8x128xf32>
    %246 = vector.extract_strided_slice %228 {offsets = [0, 256], sizes = [8, 128], strides = [1, 1]} : vector<8x384xf32> to vector<8x128xf32>
    %247 = arith.addf %246, %6 : vector<8x128xf32>
    %248 = arith.mulf %236, %247 : vector<8x128xf32>
    %249 = arith.addf %245, %248 : vector<8x128xf32>
    %250 = math.tanh %249 : vector<8x128xf32>
    %cst_53 = arith.constant 1.000000e+00 : f32
    %251 = vector.broadcast %cst_53 : f32 to vector<8x128xf32>
    %252 = arith.subf %251, %244 : vector<8x128xf32>
    %253 = arith.mulf %252, %250 : vector<8x128xf32>
    %254 = arith.mulf %244, %224 : vector<8x128xf32>
    %255 = arith.addf %253, %254 : vector<8x128xf32>
    %c8_i32 = arith.constant 8 : i32
    %c0_54 = arith.constant 0 : index
    %c0_55 = arith.constant 0 : index
    %256 = vector.load %arg6[%c0_54, %c0_55] : memref<8x128xf32, #tpu.memory_space<vmem>>, vector<8x128xf32>
    tpu.vector_store %arg6[%c0_54, %c0_55], %255 {strides = array<i32>} : memref<8x128xf32, #tpu.memory_space<vmem>>, vector<8x128xf32>,
    %c0_i32_56 = arith.constant 0 : i32
    %257 = arith.cmpi eq, %arg1, %c0_i32_56 : i32
    %258 = arith.extui %257 : i1 to i32
    %c0_i32_57 = arith.constant 0 : i32
    %259 = arith.cmpi ne, %258, %c0_i32_57 : i32
    scf.if %259 {
      %c0_58 = arith.constant 0 : index
      %c0_59 = arith.constant 0 : index
      %260 = vector.load %arg5[%c0_58, %c0_59] : memref<8x128xf32, #tpu.memory_space<vmem>>, vector<8x128xf32>
      tpu.vector_store %arg5[%c0_58, %c0_59], %255 {strides = array<i32>} : memref<8x128xf32, #tpu.memory_space<vmem>>, vector<8x128xf32>,
    } else {
    }
    return
  }
  func.func @transform_0(%arg0: i32, %arg1: i32) -> (i32, i32, i32) {
    %c0_i32 = arith.constant 0 : i32
    %c0_i32_0 = arith.constant 0 : i32
    return %arg1, %arg0, %c0_i32 : i32, i32, i32
  }
  func.func @transform_1(%arg0: i32, %arg1: i32) -> (i32, i32) {
    %c0_i32 = arith.constant 0 : i32
    %c0_i32_0 = arith.constant 0 : i32
    %c0_i32_1 = arith.constant 0 : i32
    return %c0_i32, %c0_i32_0 : i32, i32
  }
  func.func @transform_2(%arg0: i32, %arg1: i32) -> (i32, i32) {
    %c0_i32 = arith.constant 0 : i32
    %c0_i32_0 = arith.constant 0 : i32
    %c0_i32_1 = arith.constant 0 : i32
    return %c0_i32, %c0_i32_0 : i32, i32
  }
  func.func @transform_3(%arg0: i32, %arg1: i32) -> (i32, i32) {
    %c0_i32 = arith.constant 0 : i32
    %c0_i32_0 = arith.constant 0 : i32
    return %arg0, %c0_i32 : i32, i32
  }
}

</mosaic_0001>

<bundles_post_ra>
// kernel: tpu_custom_call.1
= control target key start
LH: loop header
LB: loop body
LE: loop exit
PB: predicated region body
PF: predicated region fallthrough
CT: control target
= control target key end

     0   :  { %8 = vsyncpa [#allocation4], 0  ;;  %s2938_s0 = inlined_call_operand.hbm [shape: f32[8,8,384], index: 0, kind: input, shape index: {}]   ;;  %s2939_s1 = inlined_call_operand.hbm [shape: f32[128,384], index: 1, kind: input, shape index: {}]   ;;  %s2940_s2 = inlined_call_operand.vmem [shape: f32[1,128], index: 2, kind: input, shape index: {}]   ;;  %s2941_s3 = inlined_call_operand.hbm [shape: f32[8,128], index: 3, kind: output, shape index: {}]  }
   0x1   :  { %9 = vsyncpa [#allocation7], 0 }
   0x2   :  { %10 = vsyncpa [#allocation5], 0  ;;  %s2501_s12 = smov [#allocation3]   ;;  %s2429_s16 = scalar_lea.hbm %s2938_s0, 3072 }
   0x3   :  { %s16_s13 = sshll.u32 %s2501_s12, 4  ;;  %p2430_p0 = scmp.ne.s32.totalorder %s2938_s0, %s2429_s16  ;;  %s17_s13 = int_to_ptr.vmem [resolvable:$true] %s16_s13 }
   0x4   :  { %p2433_p1 = scmp.lt.u32.totalorder %s2429_s16, %s2938_s0 }
   0x6   :  { %p2435_p2 = pnand %p2433_p1, %p2430_p0 }
   0x8   :  { %2438 = shalt.err (!%p2435_p2)
}
   0x9   :  { %s2439_s21 = scalar_lea.vmem %s17_s13, 3072  ;;  %p2444_p4 = scmp.lt.s32.totalorder %s17_s13, %s17_s13 }
   0xa   :  { %p2440_p3 = scmp.ne.s32.totalorder %s17_s13, %s2439_s21  ;;  %p2445_p5 = scmp.lt.s32.totalorder %s2439_s21, %s2439_s21 }
   0xc   :  { %p2446_p6 = por %p2445_p5, %p2444_p4 }
   0xe   :  { %p2447_p7 = pnand %p2446_p6, %p2440_p3 }
  0x10   :  { %2450 = shalt.err (!%p2447_p7)
}
  0x11   :  { %s2502_s22 = smov 384   ;;  %s2503_s23 = smov 24  }
  0x12   :  { %22 = dma.hbm_to_vmem [thread:$0]  %s2938_s0, 3072, %s17_s13, [#allocation4], %s2502_s22, %s2502_s22, %s2503_s23  }
  0x13   :  { %s2504_s26 = smov [#allocation6]   ;;  %s2451_s30 = scalar_lea.hbm %s2939_s1, 6144 }
  0x14   :  { %s28_s27 = sshll.u32 %s2504_s26, 4  ;;  %p2452_p8 = scmp.ne.s32.totalorder %s2939_s1, %s2451_s30  ;;  %s29_s27 = int_to_ptr.vmem [resolvable:$true] %s28_s27 }
  0x15   :  { %p2455_p9 = scmp.lt.u32.totalorder %s2451_s30, %s2939_s1 }
  0x17   :  { %p2457_p10 = pnand %p2455_p9, %p2452_p8 }
  0x19   :  { %2460 = shalt.err (!%p2457_p10)
}
  0x1a   :  { %s2461_s8 = scalar_lea.vmem %s29_s27, 6144  ;;  %p2466_p12 = scmp.lt.s32.totalorder %s29_s27, %s29_s27 }
  0x1b   :  { %p2462_p11 = scmp.ne.s32.totalorder %s29_s27, %s2461_s8  ;;  %p2467_p13 = scmp.lt.s32.totalorder %s2461_s8, %s2461_s8 }
  0x1d   :  { %p2468_p0 = por %p2467_p13, %p2466_p12 }
  0x1f   :  { %p2469_p1 = pnand %p2468_p0, %p2462_p11 }
  0x21   :  { %2472 = shalt.err (!%p2469_p1)
}
  0x22   :  { %34 = dma.hbm_to_vmem [thread:$0]  %s2939_s1, 6144, %s29_s27, [#allocation7], %s2502_s22, %s2502_s22, %s2503_s23  }
  0x23   :  { %2495 = dma.done.wait [#allocation4], 3072  }
  0x24   :  { %2496 = vsyncadd [#allocation4], 4294964224 }
  0x25   :  { %2497 = dma.done.wait [#allocation7], 6144  }
  0x26   :  { %2498 = vsyncadd [#allocation7], 4294961152  ;;  %v2505_v0 = vmov 0.0|0.0   ;;  %v2506_v1 = vmov 0.0   ;;  %vm2507_vm0 = vmmov 0   ;;  %v49_v2 = vld [vmem:[#allocation6 + $0x8] sm:$0xff] }
  0x27   :  { %1925 = vmatprep.subr.bf16.mxu1 %v2505_v0  ;;  %171 = vmatprep.mubr.f32.mxu0 %v2506_v1  ;;  %v52_v3 = vld [vmem:[#allocation6 + $0x20] sm:$0xff]  ;;  %v51_v6 = vld [vmem:[#allocation6 + $0x18] sm:$0xff]  ;;  %v58_v8 = vld [vmem:[#allocation6 + $0x50] sm:$0xff] }
  0x28   :  { %1645 = vmatprep.mubr.msk.f32.mxu1 %vm2507_vm0, %v2506_v1  ;;  %v48_v4 = vld [vmem:[#allocation6] sm:$0xff]  ;;  %v2557_v5 = vpack.c.bf16 %v52_v3, %v49_v2  ;;  %v55_v7 = vld [vmem:[#allocation6 + $0x38] sm:$0xff]  ;;  %v54_v11 = vld [vmem:[#allocation6 + $0x30] sm:$0xff] }
  0x29   :  { %v2559_v9 = vpack.c.bf16 %v51_v6, %v48_v4  ;;  %v2561_v10 = vpack.c.bf16 %v58_v8, %v55_v7  ;;  %v57_v12 = vld [vmem:[#allocation6 + $0x48] sm:$0xff]  ;;  %v64_v14 = vld [vmem:[#allocation6 + $0x80] sm:$0xff]  ;;  %v63_v18 = vld [vmem:[#allocation6 + $0x78] sm:$0xff] }
  0x2a   :  { %v61_v13 = vld [vmem:[#allocation6 + $0x68] sm:$0xff]  ;;  %1894 = vmatprep.subr.bf16.mxu0 %v2557_v5  ;;  %v2565_v15 = vpack.c.bf16 %v57_v12, %v54_v11  ;;  %v60_v17 = vld [vmem:[#allocation6 + $0x60] sm:$0xff]  ;;  %v67_v19 = vld [vmem:[#allocation6 + $0x98] sm:$0xff] }
  0x2b   :  { %1896 = vmatpush1.bf16.msra.mxu0 %v2559_v9  ;;  %v2568_v16 = vpack.c.bf16 %v64_v14, %v61_v13  ;;  %v70_v20 = vld [vmem:[#allocation6 + $0xb0] sm:$0xff]  ;;  %v2571_v21 = vpack.c.bf16 %v63_v18, %v60_v17  ;;  %v69_v24 = vld [vmem:[#allocation6 + $0xa8] sm:$0xff]  ;;  %v76_v28 = vld [vmem:[#allocation6 + $0xe0] sm:$0xff] }
  0x2c   :  { %1898 = vmatprep.subr.bf16.mxu0 %v2561_v10  ;;  %v66_v22 = vld [vmem:[#allocation6 + $0x90] sm:$0xff]  ;;  %v2574_v23 = vpack.c.bf16 %v70_v20, %v67_v19  ;;  %v53_v26 = vld [vmem:[#allocation6 + $0x28] sm:$0xff]  ;;  %v56_v30 = vld [vmem:[#allocation6 + $0x40] sm:$0xff] }
  0x2d   :  { %v50_v25 = vld [vmem:[#allocation6 + $0x10] sm:$0xff]  ;;  %v73_v27 = vld [vmem:[#allocation6 + $0xc8] sm:$0xff]  ;;  %v59_v31 = vld [vmem:[#allocation6 + $0x58] sm:$0xff]  ;;  %v2579_v32 = vpack.c.bf16 %v69_v24, %v66_v22 }
  0x2e   :  { %v2576_v29 = vpack.c.bf16 %v53_v26, %v50_v25  ;;  %v72_v33 = vld [vmem:[#allocation6 + $0xc0] sm:$0xff]  ;;  %v2582_v34 = vpack.c.bf16 %v59_v31, %v56_v30  ;;  %v2585_v35 = vpack.c.bf16 %v76_v28, %v73_v27  ;;  %v75_v36 = vld [vmem:[#allocation6 + $0xd8] sm:$0xff]  ;;  %v62_v37 = vld [vmem:[#allocation6 + $0x70] sm:$0xff] }
  0x2f   :  { %1900 = vmatpush1.bf16.msra.mxu0 %v2565_v15  ;;  %v65_v38 = vld [vmem:[#allocation6 + $0x88] sm:$0xff]  ;;  %v79_v39 = vld [vmem:[#allocation6 + $0xf8] sm:$0xff]  ;;  %v82_v40 = vld [vmem:[#allocation6 + $0x110] sm:$0xff]  ;;  %v2589_v41 = vpack.c.bf16 %v75_v36, %v72_v33 }
  0x30   :  { %1902 = vmatprep.subr.bf16.mxu0 %v2568_v16  ;;  %1927 = vmatpush3.bf16.msra.mxu1 %v2576_v29  ;;  %v78_v42 = vld [vmem:[#allocation6 + $0xf0] sm:$0xff]  ;;  %v2592_v43 = vpack.c.bf16 %v65_v38, %v62_v37  ;;  %v2595_v44 = vpack.c.bf16 %v82_v40, %v79_v39  ;;  %v81_v45 = vld [vmem:[#allocation6 + $0x108] sm:$0xff]  ;;  %v68_v46 = vld [vmem:[#allocation6 + $0xa0] sm:$0xff] }
  0x31   :  { %1928 = vmatprep.subr.bf16.mxu1 %v2505_v0  ;;  %v71_v47 = vld [vmem:[#allocation6 + $0xb8] sm:$0xff]  ;;  %v85_v48 = vld [vmem:[#allocation6 + $0x128] sm:$0xff]  ;;  %v88_v49 = vld [vmem:[#allocation6 + $0x140] sm:$0xff]  ;;  %v2599_v50 = vpack.c.bf16 %v81_v45, %v78_v42 }
  0x32   :  { %v84_v51 = vld [vmem:[#allocation6 + $0x120] sm:$0xff]  ;;  %v2602_v52 = vpack.c.bf16 %v71_v47, %v68_v46  ;;  %v2605_v53 = vpack.c.bf16 %v88_v49, %v85_v48  ;;  %v87_v54 = vld [vmem:[#allocation6 + $0x138] sm:$0xff]  ;;  %v74_v55 = vld [vmem:[#allocation6 + $0xd0] sm:$0xff] }
  0x33   :  { %1904 = vmatpush1.bf16.msra.mxu0 %v2571_v21  ;;  %v77_v56 = vld [vmem:[#allocation6 + $0xe8] sm:$0xff]  ;;  %v91_v57 = vld [vmem:[#allocation6 + $0x158] sm:$0xff]  ;;  %v94_v58 = vld [vmem:[#allocation6 + $0x170] sm:$0xff]  ;;  %v2609_v59 = vpack.c.bf16 %v87_v54, %v84_v51 }
  0x34   :  { %1906 = vmatprep.subr.bf16.mxu0 %v2574_v23  ;;  %1930 = vmatpush3.bf16.msra.mxu1 %v2582_v34  ;;  %v90_v60 = vld [vmem:[#allocation6 + $0x150] sm:$0xff]  ;;  %v2612_v61 = vpack.c.bf16 %v77_v56, %v74_v55  ;;  %v2615_v62 = vpack.c.bf16 %v94_v58, %v91_v57  ;;  %v93_v63 = vld [vmem:[#allocation6 + $0x168] sm:$0xff]  ;;  %v80_v2 = vld [vmem:[#allocation6 + $0x100] sm:$0xff] }
  0x35   :  { %1931 = vmatprep.subr.bf16.mxu1 %v2505_v0  ;;  %v83_v3 = vld [vmem:[#allocation6 + $0x118] sm:$0xff]  ;;  %v2619_v4 = vpack.c.bf16 %v93_v63, %v90_v60  ;;  %v86_v7 = vld [vmem:[#allocation6 + $0x130] sm:$0xff]  ;;  %v89_v8 = vld [vmem:[#allocation6 + $0x148] sm:$0xff] }
  0x36   :  { %v2622_v6 = vpack.c.bf16 %v83_v3, %v80_v2  ;;  %v2628_v11 = vpack.c.bf16 %v89_v8, %v86_v7  ;;  %v92_v12 = vld [vmem:[#allocation6 + $0x160] sm:$0xff]  ;;  %v95_v13 = vld [vmem:[#allocation6 + $0x178] sm:$0xff]  ;;  %v105_v20 = vld [vmem:[#allocation3 + $0x8] sm:$0xff] }
  0x37   :  { %1908 = vmatpush1.bf16.msra.mxu0 %v2579_v32  ;;  %v2634_v14 = vpack.c.bf16 %v95_v13, %v92_v12  ;;  %v104_v17 = vld [vmem:[#allocation3] sm:$0xff]  ;;  %v106_v40 = vld [vmem:[#allocation3 + $0x10] sm:$0xff]  ;;  %v271_v55 = vld [vmem:[#allocation3 + $0x18] sm:$0xff] }
  0x38   :  { %1910 = vmatprep.subr.bf16.mxu0 %v2585_v35  ;;  %1933 = vmatpush3.bf16.msra.mxu1 %v2592_v43  ;;  %v2678_v36 = vld [vmem:[%s2940_s2] ss:$0 sm:$0xff]  ;;  %s2508_s2 = smov [#allocation8]  }
  0x39   :  { %1934 = vmatprep.subr.bf16.mxu1 %v2505_v0  ;;  %v272_v60 = vld [vmem:[#allocation3 + $0x20] sm:$0xff]  ;;  %s1450_s11 = sshll.u32 %s2508_s2, 4  ;;  %s1451_s11 = int_to_ptr.vmem [resolvable:$true] %s1450_s11 }
  0x3a   :  { %s2473_s12 = scalar_lea.vmem %s1451_s11, 128  ;;  %p2478_p3 = scmp.lt.s32.totalorder %s1451_s11, %s1451_s11 }
  0x3b   :  { %1912 = vmatpush1.bf16.msra.mxu0 %v2589_v41  ;;  %p2474_p2 = scmp.ne.s32.totalorder %s1451_s11, %s2473_s12  ;;  %p2479_p4 = scmp.lt.s32.totalorder %s2473_s12, %s2473_s12 }
  0x3c   :  { %1914 = vmatprep.subr.bf16.mxu0 %v2595_v44  ;;  %1936 = vmatpush3.bf16.msra.mxu1 %v2602_v52 }
  0x3d   :  { %1937 = vmatprep.subr.bf16.mxu1 %v2505_v0  ;;  %p2480_p5 = por %p2479_p4, %p2478_p3 }
  0x3f   :  { %1916 = vmatpush1.bf16.msra.mxu0 %v2599_v50  ;;  %p2481_p6 = pnand %p2480_p5, %p2474_p2 }
  0x40   :  { %1918 = vmatprep.subr.bf16.mxu0 %v2605_v53  ;;  %1939 = vmatpush3.bf16.msra.mxu1 %v2612_v61 }
  0x41   :  { %1940 = vmatprep.subr.bf16.mxu1 %v2505_v0 }
  0x43   :  { %1920 = vmatpush1.bf16.msra.mxu0 %v2609_v59 }
  0x44   :  { %1922 = vmatprep.subr.bf16.mxu0 %v2615_v62  ;;  %1942 = vmatpush3.bf16.msra.mxu1 %v2622_v6 }
  0x45   :  { %1943 = vmatprep.subr.bf16.mxu1 %v2505_v0 }
  0x47   :  { %1924 = vmatpush1.bf16.msra.mxu0 %v2619_v4 }
  0x48   :  { %1950 = vmatprep.subr.bf16.mxu0 %v2557_v5  ;;  %1945 = vmatpush3.bf16.msra.mxu1 %v2628_v11 }
  0x49   :  { %1946 = vmatprep.subr.bf16.mxu1 %v2505_v0 }
  0x4a   :  { %172 = vmatmul.mubr.f32.vlgmr.msra.gmra.mrb[0].mxu0 %v2506_v1 }
  0x4b   :  { %1952 = vmatpush1.bf16.msra.mxu0 %v2559_v9  ;;  %338 = vmatprep.mubr.f32.mxu0 %v2506_v1 }
  0x4c   :  { %1954 = vmatprep.subr.bf16.mxu0 %v2561_v10  ;;  %1948 = vmatpush3.bf16.msra.mxu1 %v2634_v14 }
  0x4d   :  { %1981 = vmatprep.subr.bf16.mxu1 %v2505_v0 }
  0x4f   :  { %1956 = vmatpush1.bf16.msra.mxu0 %v2565_v15  ;;  %1646 = vmatmul.mubr.f32.vlgmr.msra.gmra.mrb[0].mxu1 %v2506_v1 }
  0x50   :  { %1958 = vmatprep.subr.bf16.mxu0 %v2568_v16  ;;  %1983 = vmatpush3.bf16.msra.mxu1 %v2576_v29 }
  0x51   :  { %1984 = vmatprep.subr.bf16.mxu1 %v2505_v0  ;;  %1680 = vmatprep.mubr.msk.f32.mxu1 %vm2507_vm0, %v2506_v1 }
  0x53   :  { %1960 = vmatpush1.bf16.msra.mxu0 %v2571_v21 }
  0x54   :  { %1962 = vmatprep.subr.bf16.mxu0 %v2574_v23  ;;  %1986 = vmatpush3.bf16.msra.mxu1 %v2582_v34 }
  0x55   :  { %1987 = vmatprep.subr.bf16.mxu1 %v2505_v0 }
  0x57   :  { %1964 = vmatpush1.bf16.msra.mxu0 %v2579_v32 }
  0x58   :  { %1966 = vmatprep.subr.bf16.mxu0 %v2585_v35  ;;  %1989 = vmatpush3.bf16.msra.mxu1 %v2592_v43 }
  0x59   :  { %1990 = vmatprep.subr.bf16.mxu1 %v2505_v0 }
  0x5b   :  { %1968 = vmatpush1.bf16.msra.mxu0 %v2589_v41 }
  0x5c   :  { %1970 = vmatprep.subr.bf16.mxu0 %v2595_v44  ;;  %1992 = vmatpush3.bf16.msra.mxu1 %v2602_v52 }
  0x5d   :  { %1993 = vmatprep.subr.bf16.mxu1 %v2505_v0 }
  0x5f   :  { %1972 = vmatpush1.bf16.msra.mxu0 %v2599_v50 }
  0x60   :  { %1974 = vmatprep.subr.bf16.mxu0 %v2605_v53  ;;  %1995 = vmatpush3.bf16.msra.mxu1 %v2612_v61 }
  0x61   :  { %1996 = vmatprep.subr.bf16.mxu1 %v2505_v0 }
  0x63   :  { %1976 = vmatpush1.bf16.msra.mxu0 %v2609_v59 }
  0x64   :  { %1978 = vmatprep.subr.bf16.mxu0 %v2615_v62  ;;  %1998 = vmatpush3.bf16.msra.mxu1 %v2622_v6 }
  0x65   :  { %1999 = vmatprep.subr.bf16.mxu1 %v2505_v0 }
  0x67   :  { %1980 = vmatpush1.bf16.msra.mxu0 %v2619_v4 }
  0x68   :  { %2006 = vmatprep.subr.bf16.mxu0 %v2557_v5  ;;  %2001 = vmatpush3.bf16.msra.mxu1 %v2628_v11 }
  0x69   :  { %2002 = vmatprep.subr.bf16.mxu1 %v2505_v0 }
  0x6c   :  { %2004 = vmatpush3.bf16.msra.mxu1 %v2634_v14 }
  0x6d   :  { %2037 = vmatprep.subr.bf16.mxu1 %v2505_v0 }
 0x11d   :  { %v173_v18 = vpop.f32.mrb[0].mxu0 }
 0x11e   :  { %v248_v19 = vadd.f32 %v173_v18, %v104_v17  ;;  %v175_v22 = vpop.f32.mrb[1].mxu0 }
 0x11f   :  { %v255_v25 = vadd.f32 %v175_v22, %v105_v20  ;;  %v273_v22 = vld [vmem:[#allocation3 + $0x28] sm:$0xff] }
 0x120   :  { %v1461_v24 = vmul.f32 -1.442695, %v248_v19 }
 0x121   :  { %v1462_v26 = vmul.f32 -1.442695, %v255_v25 }
 0x122   :  { %2349 = vpow2.f32 %v1461_v24  ;;  %v244_v27 = vpop.f32.mrb[0].mxu1 }
 0x123   :  { %v1647_v28 = vpop.f32.mrb[1].mxu1  ;;  %2351 = vpow2.f32 %v1462_v26  ;;  %v262_v38 = vadd.f32 %v2678_v36, %v244_v27 }
 0x12c   :  { %v2350_v30 = vpop.eup %2349 }
 0x12d   :  { %v252_v31 = vadd.f32 1.0, %v2350_v30  ;;  %v2352_v33 = vpop.eup %2351 }
 0x12e   :  { %v259_v37 = vadd.f32 1.0, %v2352_v33 }
 0x12f   :  { %2353 = vrcp.f32 %v252_v31 }
 0x130   :  { %2355 = vrcp.f32 %v259_v37  ;;  %v438_v37 = vld [vmem:[#allocation3 + $0x30] sm:$0xff] }
 0x139   :  { %v2354_v39 = vpop.eup %2353 }
 0x13a   :  { %v263_v42 = vmul.f32 %v2354_v39, %v262_v38  ;;  %v2356_v46 = vpop.eup %2355 }
 0x13b   :  { %v266_v47 = vsub.f32 1.0, %v2356_v46  ;;  %v268_v51 = vmul.f32 0.0, %v2356_v46 }
 0x13c   :  { %v264_v45 = vadd.f32 %v263_v42, %v106_v40  ;;  %v439_v42 = vld [vmem:[#allocation3 + $0x38] sm:$0xff] }
 0x13e   :  { %2357 = vtanh.f32 %v264_v45 }
 0x148   :  { %v2358_v48 = vpop.eup %2357 }
 0x149   :  { %v267_v49 = vmul.f32 %v2358_v48, %v266_v47 }
 0x14b   :  { %v2681_v54 = vadd.f32 %v268_v51, %v267_v49 }
 0x14d   :  { %339 = vmatmul.mubr.f32.vlgmr.msra.gmra.mrb[2].mxu0 %v2681_v54  ;;  %1681 = vmatmul.mubr.f32.vlgmr.msra.gmra.mrb[2].mxu1 %v2681_v54 }
 0x14e   :  { %2008 = vmatpush1.bf16.msra.mxu0 %v2559_v9  ;;  %2039 = vmatpush3.bf16.msra.mxu1 %v2576_v29 }
 0x14f   :  { %2010 = vmatprep.subr.bf16.mxu0 %v2561_v10  ;;  %2040 = vmatprep.subr.bf16.mxu1 %v2505_v0 }
 0x150   :  { %505 = vmatprep.mubr.f32.mxu0 %v2506_v1  ;;  %1715 = vmatprep.mubr.msk.f32.mxu1 %vm2507_vm0, %v2506_v1 }
 0x152   :  { %2012 = vmatpush1.bf16.msra.mxu0 %v2565_v15  ;;  %2042 = vmatpush3.bf16.msra.mxu1 %v2582_v34 }
 0x153   :  { %2014 = vmatprep.subr.bf16.mxu0 %v2568_v16  ;;  %2043 = vmatprep.subr.bf16.mxu1 %v2505_v0 }
 0x156   :  { %2016 = vmatpush1.bf16.msra.mxu0 %v2571_v21  ;;  %2045 = vmatpush3.bf16.msra.mxu1 %v2592_v43 }
 0x157   :  { %2018 = vmatprep.subr.bf16.mxu0 %v2574_v23  ;;  %2046 = vmatprep.subr.bf16.mxu1 %v2505_v0 }
 0x15a   :  { %2020 = vmatpush1.bf16.msra.mxu0 %v2579_v32  ;;  %2048 = vmatpush3.bf16.msra.mxu1 %v2602_v52 }
 0x15b   :  { %2022 = vmatprep.subr.bf16.mxu0 %v2585_v35  ;;  %2049 = vmatprep.subr.bf16.mxu1 %v2505_v0 }
 0x15e   :  { %2024 = vmatpush1.bf16.msra.mxu0 %v2589_v41  ;;  %2051 = vmatpush3.bf16.msra.mxu1 %v2612_v61 }
 0x15f   :  { %2026 = vmatprep.subr.bf16.mxu0 %v2595_v44  ;;  %2052 = vmatprep.subr.bf16.mxu1 %v2505_v0 }
 0x162   :  { %2028 = vmatpush1.bf16.msra.mxu0 %v2599_v50  ;;  %2054 = vmatpush3.bf16.msra.mxu1 %v2622_v6 }
 0x163   :  { %2030 = vmatprep.subr.bf16.mxu0 %v2605_v53  ;;  %2055 = vmatprep.subr.bf16.mxu1 %v2505_v0 }
 0x166   :  { %2032 = vmatpush1.bf16.msra.mxu0 %v2609_v59  ;;  %2057 = vmatpush3.bf16.msra.mxu1 %v2628_v11 }
 0x167   :  { %2034 = vmatprep.subr.bf16.mxu0 %v2615_v62  ;;  %2058 = vmatprep.subr.bf16.mxu1 %v2505_v0 }
 0x16a   :  { %2036 = vmatpush1.bf16.msra.mxu0 %v2619_v4  ;;  %2060 = vmatpush3.bf16.msra.mxu1 %v2634_v14 }
 0x16b   :  { %2062 = vmatprep.subr.bf16.mxu0 %v2557_v5  ;;  %2093 = vmatprep.subr.bf16.mxu1 %v2505_v0 }
 0x220   :  { %v340_v56 = vpop.f32.mrb[2].mxu0  ;;  %v411_v57 = vpop.f32.mrb[2].mxu1 }
 0x221   :  { %v415_v58 = vadd.f32 %v340_v56, %v271_v55  ;;  %v342_v63 = vpop.f32.mrb[3].mxu0  ;;  %v1682_v2 = vpop.f32.mrb[3].mxu1  ;;  %v429_v19 = vadd.f32 %v2678_v36, %v411_v57 }
 0x222   :  { %v422_v7 = vadd.f32 %v342_v63, %v272_v60  ;;  %v440_v60 = vld [vmem:[#allocation3 + $0x40] sm:$0xff] }
 0x223   :  { %v1463_v3 = vmul.f32 -1.442695, %v415_v58 }
 0x224   :  { %v1464_v8 = vmul.f32 -1.442695, %v422_v7 }
 0x225   :  { %2359 = vpow2.f32 %v1463_v3 }
 0x226   :  { %2361 = vpow2.f32 %v1464_v8 }
 0x22f   :  { %v2360_v12 = vpop.eup %2359 }
 0x230   :  { %v419_v13 = vadd.f32 1.0, %v2360_v12  ;;  %v2362_v17 = vpop.eup %2361 }
 0x231   :  { %v426_v18 = vadd.f32 1.0, %v2362_v17 }
 0x232   :  { %2363 = vrcp.f32 %v419_v13 }
 0x233   :  { %2365 = vrcp.f32 %v426_v18  ;;  %v605_v18 = vld [vmem:[#allocation3 + $0x48] sm:$0xff] }
 0x23c   :  { %v2364_v20 = vpop.eup %2363 }
 0x23d   :  { %v430_v24 = vmul.f32 %v2364_v20, %v429_v19  ;;  %v2366_v26 = vpop.eup %2365 }
 0x23e   :  { %v433_v27 = vsub.f32 1.0, %v2366_v26  ;;  %v435_v31 = vmul.f32 %v2366_v26, %v2681_v54 }
 0x23f   :  { %v431_v25 = vadd.f32 %v430_v24, %v273_v22  ;;  %v606_v24 = vld [vmem:[#allocation3 + $0x50] sm:$0xff] }
 0x241   :  { %2367 = vtanh.f32 %v431_v25 }
 0x24b   :  { %v2368_v28 = vpop.eup %2367 }
 0x24c   :  { %v434_v30 = vmul.f32 %v2368_v28, %v433_v27 }
 0x24e   :  { %v2722_v33 = vadd.f32 %v435_v31, %v434_v30 }
 0x250   :  { %506 = vmatmul.mubr.f32.vlgmr.msra.gmra.mrb[4].mxu0 %v2722_v33  ;;  %1716 = vmatmul.mubr.f32.vlgmr.msra.gmra.mrb[4].mxu1 %v2722_v33 }
 0x251   :  { %2064 = vmatpush1.bf16.msra.mxu0 %v2559_v9  ;;  %2095 = vmatpush3.bf16.msra.mxu1 %v2576_v29 }
 0x252   :  { %2066 = vmatprep.subr.bf16.mxu0 %v2561_v10  ;;  %2096 = vmatprep.subr.bf16.mxu1 %v2505_v0 }
 0x253   :  { %672 = vmatprep.mubr.f32.mxu0 %v2506_v1  ;;  %1750 = vmatprep.mubr.msk.f32.mxu1 %vm2507_vm0, %v2506_v1 }
 0x255   :  { %2068 = vmatpush1.bf16.msra.mxu0 %v2565_v15  ;;  %2098 = vmatpush3.bf16.msra.mxu1 %v2582_v34 }
 0x256   :  { %2070 = vmatprep.subr.bf16.mxu0 %v2568_v16  ;;  %2099 = vmatprep.subr.bf16.mxu1 %v2505_v0 }
 0x259   :  { %2072 = vmatpush1.bf16.msra.mxu0 %v2571_v21  ;;  %2101 = vmatpush3.bf16.msra.mxu1 %v2592_v43 }
 0x25a   :  { %2074 = vmatprep.subr.bf16.mxu0 %v2574_v23  ;;  %2102 = vmatprep.subr.bf16.mxu1 %v2505_v0 }
 0x25d   :  { %2076 = vmatpush1.bf16.msra.mxu0 %v2579_v32  ;;  %2104 = vmatpush3.bf16.msra.mxu1 %v2602_v52 }
 0x25e   :  { %2078 = vmatprep.subr.bf16.mxu0 %v2585_v35  ;;  %2105 = vmatprep.subr.bf16.mxu1 %v2505_v0 }
 0x261   :  { %2080 = vmatpush1.bf16.msra.mxu0 %v2589_v41  ;;  %2107 = vmatpush3.bf16.msra.mxu1 %v2612_v61 }
 0x262   :  { %2082 = vmatprep.subr.bf16.mxu0 %v2595_v44  ;;  %2108 = vmatprep.subr.bf16.mxu1 %v2505_v0 }
 0x265   :  { %2084 = vmatpush1.bf16.msra.mxu0 %v2599_v50  ;;  %2110 = vmatpush3.bf16.msra.mxu1 %v2622_v6 }
 0x266   :  { %2086 = vmatprep.subr.bf16.mxu0 %v2605_v53  ;;  %2111 = vmatprep.subr.bf16.mxu1 %v2505_v0 }
 0x269   :  { %2088 = vmatpush1.bf16.msra.mxu0 %v2609_v59  ;;  %2113 = vmatpush3.bf16.msra.mxu1 %v2628_v11 }
 0x26a   :  { %2090 = vmatprep.subr.bf16.mxu0 %v2615_v62  ;;  %2114 = vmatprep.subr.bf16.mxu1 %v2505_v0 }
 0x26d   :  { %2092 = vmatpush1.bf16.msra.mxu0 %v2619_v4  ;;  %2116 = vmatpush3.bf16.msra.mxu1 %v2634_v14 }
 0x26e   :  { %2118 = vmatprep.subr.bf16.mxu0 %v2557_v5  ;;  %2149 = vmatprep.subr.bf16.mxu1 %v2505_v0 }
 0x323   :  { %v507_v38 = vpop.f32.mrb[4].mxu0  ;;  %v578_v39 = vpop.f32.mrb[4].mxu1 }
 0x324   :  { %v582_v40 = vadd.f32 %v507_v38, %v438_v37  ;;  %v509_v45 = vpop.f32.mrb[5].mxu0  ;;  %v1717_v46 = vpop.f32.mrb[5].mxu1  ;;  %v596_v57 = vadd.f32 %v2678_v36, %v578_v39 }
 0x325   :  { %v589_v48 = vadd.f32 %v509_v45, %v439_v42  ;;  %v607_v42 = vld [vmem:[#allocation3 + $0x58] sm:$0xff] }
 0x326   :  { %v1465_v47 = vmul.f32 -1.442695, %v582_v40 }
 0x327   :  { %v1466_v49 = vmul.f32 -1.442695, %v589_v48 }
 0x328   :  { %2369 = vpow2.f32 %v1465_v47 }
 0x329   :  { %2371 = vpow2.f32 %v1466_v49 }
 0x332   :  { %v2370_v51 = vpop.eup %2369 }
 0x333   :  { %v586_v54 = vadd.f32 1.0, %v2370_v51  ;;  %v2372_v55 = vpop.eup %2371 }
 0x334   :  { %v593_v56 = vadd.f32 1.0, %v2372_v55 }
 0x335   :  { %2373 = vrcp.f32 %v586_v54 }
 0x336   :  { %2375 = vrcp.f32 %v593_v56  ;;  %v772_v56 = vld [vmem:[#allocation3 + $0x60] sm:$0xff] }
 0x33f   :  { %v2374_v58 = vpop.eup %2373 }
 0x340   :  { %v597_v63 = vmul.f32 %v2374_v58, %v596_v57  ;;  %v2376_v3 = vpop.eup %2375 }
 0x341   :  { %v600_v7 = vsub.f32 1.0, %v2376_v3  ;;  %v602_v13 = vmul.f32 %v2376_v3, %v2722_v33 }
 0x342   :  { %v598_v2 = vadd.f32 %v597_v63, %v440_v60  ;;  %v773_v63 = vld [vmem:[#allocation3 + $0x68] sm:$0xff] }
 0x344   :  { %2377 = vtanh.f32 %v598_v2 }
 0x34e   :  { %v2378_v8 = vpop.eup %2377 }
 0x34f   :  { %v601_v12 = vmul.f32 %v2378_v8, %v600_v7 }
 0x351   :  { %v2763_v17 = vadd.f32 %v602_v13, %v601_v12 }
 0x353   :  { %673 = vmatmul.mubr.f32.vlgmr.msra.gmra.mrb[6].mxu0 %v2763_v17  ;;  %1751 = vmatmul.mubr.f32.vlgmr.msra.gmra.mrb[6].mxu1 %v2763_v17 }
 0x354   :  { %2120 = vmatpush1.bf16.msra.mxu0 %v2559_v9  ;;  %2151 = vmatpush3.bf16.msra.mxu1 %v2576_v29 }
 0x355   :  { %2122 = vmatprep.subr.bf16.mxu0 %v2561_v10  ;;  %2152 = vmatprep.subr.bf16.mxu1 %v2505_v0 }
 0x356   :  { %839 = vmatprep.mubr.f32.mxu0 %v2506_v1  ;;  %1785 = vmatprep.mubr.msk.f32.mxu1 %vm2507_vm0, %v2506_v1 }
 0x358   :  { %2124 = vmatpush1.bf16.msra.mxu0 %v2565_v15  ;;  %2154 = vmatpush3.bf16.msra.mxu1 %v2582_v34 }
 0x359   :  { %2126 = vmatprep.subr.bf16.mxu0 %v2568_v16  ;;  %2155 = vmatprep.subr.bf16.mxu1 %v2505_v0 }
 0x35c   :  { %2128 = vmatpush1.bf16.msra.mxu0 %v2571_v21  ;;  %2157 = vmatpush3.bf16.msra.mxu1 %v2592_v43 }
 0x35d   :  { %2130 = vmatprep.subr.bf16.mxu0 %v2574_v23  ;;  %2158 = vmatprep.subr.bf16.mxu1 %v2505_v0 }
 0x360   :  { %2132 = vmatpush1.bf16.msra.mxu0 %v2579_v32  ;;  %2160 = vmatpush3.bf16.msra.mxu1 %v2602_v52 }
 0x361   :  { %2134 = vmatprep.subr.bf16.mxu0 %v2585_v35  ;;  %2161 = vmatprep.subr.bf16.mxu1 %v2505_v0 }
 0x364   :  { %2136 = vmatpush1.bf16.msra.mxu0 %v2589_v41  ;;  %2163 = vmatpush3.bf16.msra.mxu1 %v2612_v61 }
 0x365   :  { %2138 = vmatprep.subr.bf16.mxu0 %v2595_v44  ;;  %2164 = vmatprep.subr.bf16.mxu1 %v2505_v0 }
 0x368   :  { %2140 = vmatpush1.bf16.msra.mxu0 %v2599_v50  ;;  %2166 = vmatpush3.bf16.msra.mxu1 %v2622_v6 }
 0x369   :  { %2142 = vmatprep.subr.bf16.mxu0 %v2605_v53  ;;  %2167 = vmatprep.subr.bf16.mxu1 %v2505_v0 }
 0x36c   :  { %2144 = vmatpush1.bf16.msra.mxu0 %v2609_v59  ;;  %2169 = vmatpush3.bf16.msra.mxu1 %v2628_v11 }
 0x36d   :  { %2146 = vmatprep.subr.bf16.mxu0 %v2615_v62  ;;  %2170 = vmatprep.subr.bf16.mxu1 %v2505_v0 }
 0x370   :  { %2148 = vmatpush1.bf16.msra.mxu0 %v2619_v4  ;;  %2172 = vmatpush3.bf16.msra.mxu1 %v2634_v14 }
 0x371   :  { %2174 = vmatprep.subr.bf16.mxu0 %v2557_v5  ;;  %2205 = vmatprep.subr.bf16.mxu1 %v2505_v0 }
 0x426   :  { %v674_v19 = vpop.f32.mrb[6].mxu0  ;;  %v745_v20 = vpop.f32.mrb[6].mxu1 }
 0x427   :  { %v749_v22 = vadd.f32 %v674_v19, %v605_v18  ;;  %v676_v25 = vpop.f32.mrb[7].mxu0  ;;  %v1752_v26 = vpop.f32.mrb[7].mxu1  ;;  %v763_v39 = vadd.f32 %v2678_v36, %v745_v20 }
 0x428   :  { %v756_v28 = vadd.f32 %v676_v25, %v606_v24  ;;  %v774_v24 = vld [vmem:[#allocation3 + $0x70] sm:$0xff] }
 0x429   :  { %v1467_v27 = vmul.f32 -1.442695, %v749_v22 }
 0x42a   :  { %v1468_v30 = vmul.f32 -1.442695, %v756_v28 }
 0x42b   :  { %2379 = vpow2.f32 %v1467_v27 }
 0x42c   :  { %2381 = vpow2.f32 %v1468_v30 }
 0x435   :  { %v2380_v31 = vpop.eup %2379 }
 0x436   :  { %v753_v33 = vadd.f32 1.0, %v2380_v31  ;;  %v2382_v37 = vpop.eup %2381 }
 0x437   :  { %v760_v38 = vadd.f32 1.0, %v2382_v37 }
 0x438   :  { %2383 = vrcp.f32 %v753_v33 }
 0x439   :  { %2385 = vrcp.f32 %v760_v38  ;;  %v939_v38 = vld [vmem:[#allocation3 + $0x78] sm:$0xff] }
 0x442   :  { %v2384_v40 = vpop.eup %2383 }
 0x443   :  { %v764_v45 = vmul.f32 %v2384_v40, %v763_v39  ;;  %v2386_v47 = vpop.eup %2385 }
 0x444   :  { %v767_v48 = vsub.f32 1.0, %v2386_v47  ;;  %v769_v54 = vmul.f32 %v2386_v47, %v2763_v17 }
 0x445   :  { %v765_v46 = vadd.f32 %v764_v45, %v607_v42  ;;  %v940_v45 = vld [vmem:[#allocation3 + $0x80] sm:$0xff] }
 0x447   :  { %2387 = vtanh.f32 %v765_v46 }
 0x451   :  { %v2388_v49 = vpop.eup %2387 }
 0x452   :  { %v768_v51 = vmul.f32 %v2388_v49, %v767_v48 }
 0x454   :  { %v2804_v55 = vadd.f32 %v769_v54, %v768_v51 }
 0x456   :  { %840 = vmatmul.mubr.f32.vlgmr.msra.gmra.mrb[8].mxu0 %v2804_v55  ;;  %1786 = vmatmul.mubr.f32.vlgmr.msra.gmra.mrb[8].mxu1 %v2804_v55 }
 0x457   :  { %2176 = vmatpush1.bf16.msra.mxu0 %v2559_v9  ;;  %2207 = vmatpush3.bf16.msra.mxu1 %v2576_v29 }
 0x458   :  { %2178 = vmatprep.subr.bf16.mxu0 %v2561_v10  ;;  %2208 = vmatprep.subr.bf16.mxu1 %v2505_v0 }
 0x459   :  { %1006 = vmatprep.mubr.f32.mxu0 %v2506_v1  ;;  %1820 = vmatprep.mubr.msk.f32.mxu1 %vm2507_vm0, %v2506_v1 }
 0x45b   :  { %2180 = vmatpush1.bf16.msra.mxu0 %v2565_v15  ;;  %2210 = vmatpush3.bf16.msra.mxu1 %v2582_v34 }
 0x45c   :  { %2182 = vmatprep.subr.bf16.mxu0 %v2568_v16  ;;  %2211 = vmatprep.subr.bf16.mxu1 %v2505_v0 }
 0x45f   :  { %2184 = vmatpush1.bf16.msra.mxu0 %v2571_v21  ;;  %2213 = vmatpush3.bf16.msra.mxu1 %v2592_v43 }
 0x460   :  { %2186 = vmatprep.subr.bf16.mxu0 %v2574_v23  ;;  %2214 = vmatprep.subr.bf16.mxu1 %v2505_v0 }
 0x463   :  { %2188 = vmatpush1.bf16.msra.mxu0 %v2579_v32  ;;  %2216 = vmatpush3.bf16.msra.mxu1 %v2602_v52 }
 0x464   :  { %2190 = vmatprep.subr.bf16.mxu0 %v2585_v35  ;;  %2217 = vmatprep.subr.bf16.mxu1 %v2505_v0 }
 0x467   :  { %2192 = vmatpush1.bf16.msra.mxu0 %v2589_v41  ;;  %2219 = vmatpush3.bf16.msra.mxu1 %v2612_v61 }
 0x468   :  { %2194 = vmatprep.subr.bf16.mxu0 %v2595_v44  ;;  %2220 = vmatprep.subr.bf16.mxu1 %v2505_v0 }
 0x46b   :  { %2196 = vmatpush1.bf16.msra.mxu0 %v2599_v50  ;;  %2222 = vmatpush3.bf16.msra.mxu1 %v2622_v6 }
 0x46c   :  { %2198 = vmatprep.subr.bf16.mxu0 %v2605_v53  ;;  %2223 = vmatprep.subr.bf16.mxu1 %v2505_v0 }
 0x46f   :  { %2200 = vmatpush1.bf16.msra.mxu0 %v2609_v59  ;;  %2225 = vmatpush3.bf16.msra.mxu1 %v2628_v11 }
 0x470   :  { %2202 = vmatprep.subr.bf16.mxu0 %v2615_v62  ;;  %2226 = vmatprep.subr.bf16.mxu1 %v2505_v0 }
 0x473   :  { %2204 = vmatpush1.bf16.msra.mxu0 %v2619_v4  ;;  %2228 = vmatpush3.bf16.msra.mxu1 %v2634_v14 }
 0x474   :  { %2230 = vmatprep.subr.bf16.mxu0 %v2557_v5  ;;  %2261 = vmatprep.subr.bf16.mxu1 %v2505_v0 }
 0x529   :  { %v841_v57 = vpop.f32.mrb[8].mxu0  ;;  %v912_v58 = vpop.f32.mrb[8].mxu1 }
 0x52a   :  { %v916_v60 = vadd.f32 %v841_v57, %v772_v56  ;;  %v843_v2 = vpop.f32.mrb[9].mxu0  ;;  %v1787_v3 = vpop.f32.mrb[9].mxu1  ;;  %v930_v20 = vadd.f32 %v2678_v36, %v912_v58 }
 0x52b   :  { %v923_v8 = vadd.f32 %v843_v2, %v773_v63 }
 0x52c   :  { %v1469_v7 = vmul.f32 -1.442695, %v916_v60  ;;  %v941_v60 = vld [vmem:[#allocation3 + $0x88] sm:$0xff] }
 0x52d   :  { %v1470_v12 = vmul.f32 -1.442695, %v923_v8 }
 0x52e   :  { %2389 = vpow2.f32 %v1469_v7 }
 0x52f   :  { %2391 = vpow2.f32 %v1470_v12 }
 0x538   :  { %v2390_v13 = vpop.eup %2389 }
 0x539   :  { %v920_v17 = vadd.f32 1.0, %v2390_v13  ;;  %v2392_v18 = vpop.eup %2391 }
 0x53a   :  { %v927_v19 = vadd.f32 1.0, %v2392_v18  ;;  %v1273_v18 = vld [vmem:[#allocation3 + $0xa8] sm:$0xff] }
 0x53b   :  { %2393 = vrcp.f32 %v920_v17 }
 0x53c   :  { %2395 = vrcp.f32 %v927_v19 }
 0x545   :  { %v2394_v22 = vpop.eup %2393 }
 0x546   :  { %v931_v25 = vmul.f32 %v2394_v22, %v930_v20  ;;  %v2396_v27 = vpop.eup %2395 }
 0x547   :  { %v934_v28 = vsub.f32 1.0, %v2396_v27  ;;  %v936_v33 = vmul.f32 %v2396_v27, %v2804_v55 }
 0x548   :  { %v932_v26 = vadd.f32 %v931_v25, %v774_v24  ;;  %v1274_v24 = vld [vmem:[#allocation3 + $0xb0] sm:$0xff] }
 0x54a   :  { %2397 = vtanh.f32 %v932_v26 }
 0x554   :  { %v2398_v30 = vpop.eup %2397 }
 0x555   :  { %v935_v31 = vmul.f32 %v2398_v30, %v934_v28 }
 0x557   :  { %v2845_v37 = vadd.f32 %v936_v33, %v935_v31 }
 0x559   :  { %1007 = vmatmul.mubr.f32.vlgmr.msra.gmra.mrb[10].mxu0 %v2845_v37  ;;  %1821 = vmatmul.mubr.f32.vlgmr.msra.gmra.mrb[10].mxu1 %v2845_v37 }
 0x55a   :  { %2232 = vmatpush1.bf16.msra.mxu0 %v2559_v9  ;;  %2263 = vmatpush3.bf16.msra.mxu1 %v2576_v29 }
 0x55b   :  { %2234 = vmatprep.subr.bf16.mxu0 %v2561_v10  ;;  %2264 = vmatprep.subr.bf16.mxu1 %v2505_v0 }
 0x55c   :  { %1173 = vmatprep.mubr.f32.mxu0 %v2506_v1  ;;  %1855 = vmatprep.mubr.msk.f32.mxu1 %vm2507_vm0, %v2506_v1 }
 0x55e   :  { %2236 = vmatpush1.bf16.msra.mxu0 %v2565_v15  ;;  %2266 = vmatpush3.bf16.msra.mxu1 %v2582_v34 }
 0x55f   :  { %2238 = vmatprep.subr.bf16.mxu0 %v2568_v16  ;;  %2267 = vmatprep.subr.bf16.mxu1 %v2505_v0 }
 0x562   :  { %2240 = vmatpush1.bf16.msra.mxu0 %v2571_v21  ;;  %2269 = vmatpush3.bf16.msra.mxu1 %v2592_v43 }
 0x563   :  { %2242 = vmatprep.subr.bf16.mxu0 %v2574_v23  ;;  %2270 = vmatprep.subr.bf16.mxu1 %v2505_v0 }
 0x566   :  { %2244 = vmatpush1.bf16.msra.mxu0 %v2579_v32  ;;  %2272 = vmatpush3.bf16.msra.mxu1 %v2602_v52 }
 0x567   :  { %2246 = vmatprep.subr.bf16.mxu0 %v2585_v35  ;;  %2273 = vmatprep.subr.bf16.mxu1 %v2505_v0 }
 0x56a   :  { %2248 = vmatpush1.bf16.msra.mxu0 %v2589_v41  ;;  %2275 = vmatpush3.bf16.msra.mxu1 %v2612_v61 }
 0x56b   :  { %2250 = vmatprep.subr.bf16.mxu0 %v2595_v44  ;;  %2276 = vmatprep.subr.bf16.mxu1 %v2505_v0 }
 0x56e   :  { %2252 = vmatpush1.bf16.msra.mxu0 %v2599_v50  ;;  %2278 = vmatpush3.bf16.msra.mxu1 %v2622_v6 }
 0x56f   :  { %2254 = vmatprep.subr.bf16.mxu0 %v2605_v53  ;;  %2279 = vmatprep.subr.bf16.mxu1 %v2505_v0 }
 0x572   :  { %2256 = vmatpush1.bf16.msra.mxu0 %v2609_v59  ;;  %2281 = vmatpush3.bf16.msra.mxu1 %v2628_v11 }
 0x573   :  { %2258 = vmatprep.subr.bf16.mxu0 %v2615_v62  ;;  %2282 = vmatprep.subr.bf16.mxu1 %v2505_v0 }
 0x576   :  { %2260 = vmatpush1.bf16.msra.mxu0 %v2619_v4  ;;  %2284 = vmatpush3.bf16.msra.mxu1 %v2634_v14 }
 0x577   :  { %2286 = vmatprep.subr.bf16.mxu0 %v2557_v5  ;;  %2317 = vmatprep.subr.bf16.mxu1 %v2505_v0 }
 0x62c   :  { %v1008_v39 = vpop.f32.mrb[10].mxu0  ;;  %v1079_v40 = vpop.f32.mrb[10].mxu1 }
 0x62d   :  { %v1083_v42 = vadd.f32 %v1008_v39, %v939_v38  ;;  %v1010_v46 = vpop.f32.mrb[11].mxu0  ;;  %v1822_v47 = vpop.f32.mrb[11].mxu1  ;;  %v1097_v5 = vadd.f32 %v2678_v36, %v1079_v40 }
 0x62e   :  { %v1090_v49 = vadd.f32 %v1010_v46, %v940_v45 }
 0x62f   :  { %v1471_v48 = vmul.f32 -1.442695, %v1083_v42  ;;  %v1275_v42 = vld [vmem:[#allocation3 + $0xb8] sm:$0xff] }
 0x630   :  { %v1472_v51 = vmul.f32 -1.442695, %v1090_v49 }
 0x631   :  { %2399 = vpow2.f32 %v1471_v48 }
 0x632   :  { %2401 = vpow2.f32 %v1472_v51 }
 0x63b   :  { %v2400_v54 = vpop.eup %2399 }
 0x63c   :  { %v1087_v55 = vadd.f32 1.0, %v2400_v54  ;;  %v2402_v56 = vpop.eup %2401 }
 0x63d   :  { %v1094_v57 = vadd.f32 1.0, %v2402_v56 }
 0x63e   :  { %2403 = vrcp.f32 %v1087_v55 }
 0x63f   :  { %2405 = vrcp.f32 %v1094_v57 }
 0x648   :  { %v2404_v58 = vpop.eup %2403 }
 0x649   :  { %v1098_v63 = vmul.f32 %v2404_v58, %v1097_v5  ;;  %v2406_v3 = vpop.eup %2405 }
 0x64a   :  { %v1101_v7 = vsub.f32 1.0, %v2406_v3  ;;  %v1103_v13 = vmul.f32 %v2406_v3, %v2845_v37 }
 0x64b   :  { %v1099_v2 = vadd.f32 %v1098_v63, %v941_v60 }
 0x64d   :  { %2407 = vtanh.f32 %v1099_v2 }
 0x657   :  { %v2408_v8 = vpop.eup %2407 }
 0x658   :  { %v1102_v12 = vmul.f32 %v2408_v8, %v1101_v7 }
 0x65a   :  { %v2886_v17 = vadd.f32 %v1103_v13, %v1102_v12 }
 0x65c   :  { %1174 = vmatmul.mubr.f32.vlgmr.msra.gmra.mrb[12].mxu0 %v2886_v17  ;;  %1856 = vmatmul.mubr.f32.vlgmr.msra.gmra.mrb[12].mxu1 %v2886_v17 }
 0x65d   :  { %2288 = vmatpush1.bf16.msra.mxu0 %v2559_v9  ;;  %2319 = vmatpush3.bf16.msra.mxu1 %v2576_v29 }
 0x65e   :  { %2290 = vmatprep.subr.bf16.mxu0 %v2561_v10  ;;  %2320 = vmatprep.subr.bf16.mxu1 %v2505_v0 }
 0x65f   :  { %1340 = vmatprep.mubr.f32.mxu0 %v2506_v1  ;;  %1890 = vmatprep.mubr.msk.f32.mxu1 %vm2507_vm0, %v2506_v1  ;;  %v1106_v1 = vld [vmem:[#allocation3 + $0x90] sm:$0xff] }
 0x661   :  { %2292 = vmatpush1.bf16.msra.mxu0 %v2565_v15  ;;  %2322 = vmatpush3.bf16.msra.mxu1 %v2582_v34 }
 0x662   :  { %2294 = vmatprep.subr.bf16.mxu0 %v2568_v16  ;;  %2323 = vmatprep.subr.bf16.mxu1 %v2505_v0  ;;  %v1107_v16 = vld [vmem:[#allocation3 + $0x98] sm:$0xff] }
 0x665   :  { %2296 = vmatpush1.bf16.msra.mxu0 %v2571_v21  ;;  %2325 = vmatpush3.bf16.msra.mxu1 %v2592_v43 }
 0x666   :  { %2298 = vmatprep.subr.bf16.mxu0 %v2574_v23  ;;  %2326 = vmatprep.subr.bf16.mxu1 %v2505_v0 }
 0x669   :  { %2300 = vmatpush1.bf16.msra.mxu0 %v2579_v32  ;;  %2328 = vmatpush3.bf16.msra.mxu1 %v2602_v52  ;;  %v1108_v52 = vld [vmem:[#allocation3 + $0xa0] sm:$0xff] }
 0x66a   :  { %2302 = vmatprep.subr.bf16.mxu0 %v2585_v35  ;;  %2329 = vmatprep.subr.bf16.mxu1 %v2505_v0 }
 0x66d   :  { %2304 = vmatpush1.bf16.msra.mxu0 %v2589_v41  ;;  %2331 = vmatpush3.bf16.msra.mxu1 %v2612_v61 }
 0x66e   :  { %2306 = vmatprep.subr.bf16.mxu0 %v2595_v44  ;;  %2332 = vmatprep.subr.bf16.mxu1 %v2505_v0 }
 0x671   :  { %2308 = vmatpush1.bf16.msra.mxu0 %v2599_v50  ;;  %2334 = vmatpush3.bf16.msra.mxu1 %v2622_v6 }
 0x672   :  { %2310 = vmatprep.subr.bf16.mxu0 %v2605_v53  ;;  %2335 = vmatprep.subr.bf16.mxu1 %v2505_v0 }
 0x675   :  { %2312 = vmatpush1.bf16.msra.mxu0 %v2609_v59  ;;  %2337 = vmatpush3.bf16.msra.mxu1 %v2628_v11 }
 0x676   :  { %2314 = vmatprep.subr.bf16.mxu0 %v2615_v62  ;;  %2338 = vmatprep.subr.bf16.mxu1 %v2505_v0 }
 0x679   :  { %2316 = vmatpush1.bf16.msra.mxu0 %v2619_v4  ;;  %2340 = vmatpush3.bf16.msra.mxu1 %v2634_v14 }
 0x72f   :  { %v1175_v9 = vpop.f32.mrb[12].mxu0  ;;  %v1246_v10 = vpop.f32.mrb[12].mxu1 }
 0x730   :  { %v1250_v15 = vadd.f32 %v1175_v9, %v1106_v1  ;;  %v1177_v21 = vpop.f32.mrb[13].mxu0  ;;  %v1857_v23 = vpop.f32.mrb[13].mxu1  ;;  %v1264_v44 = vadd.f32 %v2678_v36, %v1246_v10 }
 0x731   :  { %v1257_v32 = vadd.f32 %v1177_v21, %v1107_v16 }
 0x732   :  { %v1473_v29 = vmul.f32 -1.442695, %v1250_v15 }
 0x733   :  { %v1474_v34 = vmul.f32 -1.442695, %v1257_v32 }
 0x734   :  { %2409 = vpow2.f32 %v1473_v29 }
 0x735   :  { %2411 = vpow2.f32 %v1474_v34 }
 0x73e   :  { %v2410_v35 = vpop.eup %2409 }
 0x73f   :  { %v1254_v41 = vadd.f32 1.0, %v2410_v35  ;;  %v2412_v0 = vpop.eup %2411 }
 0x740   :  { %v1261_v43 = vadd.f32 1.0, %v2412_v0 }
 0x741   :  { %2413 = vrcp.f32 %v1254_v41 }
 0x742   :  { %2415 = vrcp.f32 %v1261_v43 }
 0x74b   :  { %v2414_v50 = vpop.eup %2413 }
 0x74c   :  { %v1265_v53 = vmul.f32 %v2414_v50, %v1264_v44  ;;  %v2416_v61 = vpop.eup %2415 }
 0x74d   :  { %v1268_v62 = vsub.f32 1.0, %v2416_v61  ;;  %v1270_v11 = vmul.f32 %v2416_v61, %v2886_v17 }
 0x74e   :  { %v1266_v59 = vadd.f32 %v1265_v53, %v1108_v52 }
 0x750   :  { %2417 = vtanh.f32 %v1266_v59 }
 0x75a   :  { %v2418_v4 = vpop.eup %2417 }
 0x75b   :  { %v1269_v6 = vmul.f32 %v2418_v4, %v1268_v62 }
 0x75d   :  { %v1271_v14 = vadd.f32 %v1270_v11, %v1269_v6 }
 0x75f   :  { %1341 = vmatmul.mubr.f32.vlgmr.msra.gmra.mrb[14].mxu0 %v1271_v14  ;;  %1891 = vmatmul.mubr.f32.vlgmr.msra.gmra.mrb[14].mxu1 %v1271_v14 }
 0x832   :  { %v1342_v19 = vpop.f32.mrb[14].mxu0  ;;  %v1413_v20 = vpop.f32.mrb[14].mxu1 }
 0x833   :  { %v1417_v22 = vadd.f32 %v1342_v19, %v1273_v18  ;;  %v1344_v25 = vpop.f32.mrb[15].mxu0  ;;  %v1892_v26 = vpop.f32.mrb[15].mxu1  ;;  %v1431_v39 = vadd.f32 %v2678_v36, %v1413_v20 }
 0x834   :  { %v1424_v28 = vadd.f32 %v1344_v25, %v1274_v24 }
 0x835   :  { %v1475_v27 = vmul.f32 -1.442695, %v1417_v22 }
 0x836   :  { %v1476_v30 = vmul.f32 -1.442695, %v1424_v28 }
 0x837   :  { %2419 = vpow2.f32 %v1475_v27 }
 0x838   :  { %2421 = vpow2.f32 %v1476_v30 }
 0x841   :  { %v2420_v31 = vpop.eup %2419 }
 0x842   :  { %v1421_v33 = vadd.f32 1.0, %v2420_v31  ;;  %v2422_v37 = vpop.eup %2421 }
 0x843   :  { %v1428_v38 = vadd.f32 1.0, %v2422_v37 }
 0x844   :  { %2423 = vrcp.f32 %v1421_v33 }
 0x845   :  { %2425 = vrcp.f32 %v1428_v38 }
 0x84e   :  { %v2424_v40 = vpop.eup %2423 }
 0x84f   :  { %v1432_v45 = vmul.f32 %v2424_v40, %v1431_v39  ;;  %v2426_v47 = vpop.eup %2425 }
 0x850   :  { %v1435_v48 = vsub.f32 1.0, %v2426_v47  ;;  %v1437_v54 = vmul.f32 %v2426_v47, %v1271_v14 }
 0x851   :  { %v1433_v46 = vadd.f32 %v1432_v45, %v1275_v42 }
 0x853   :  { %2427 = vtanh.f32 %v1433_v46 }
 0x85d   :  { %v2428_v49 = vpop.eup %2427 }
 0x85e   :  { %v1436_v51 = vmul.f32 %v2428_v49, %v1435_v48 }
 0x860   :  { %v1438_v55 = vadd.f32 %v1437_v54, %v1436_v51 }
 0x862   :  { %1443 = vst [vmem:[#allocation8] sm:$0xff] %v1438_v55 }
 0x863   :  { %2484 = shalt.err (!%p2481_p6)
}
 0x864   :  { %s2485_s15 = scalar_lea.hbm %s2941_s3, 128 }
 0x865   :  { %p2486_p7 = scmp.ne.s32.totalorder %s2941_s3, %s2485_s15  ;;  %p2489_p8 = scmp.lt.u32.totalorder %s2485_s15, %s2941_s3 }
 0x867   :  { %p2491_p9 = pnand %p2489_p8, %p2486_p7 }
 0x869   :  { %2494 = shalt.err (!%p2491_p9)
}
 0x86a   :  { %1453 = dma.vmem_to_hbm [thread:$0]  %s1451_s11, 128, %s2941_s3, [#allocation5]  }
 0x86b   :  { %2499 = dma.done.wait [#allocation5], 128  }
 0x86c   :  { %2500 = vsyncadd [#allocation5], 4294967168 }
 0x86d   :  { %1457 = vsyncpa [#allocation4], 1 }
 0x86e   :  { %1458 = vsyncpa [#allocation7], 1 }
 0x86f   :  { %1459 = vsyncpa [#allocation5], 1 }

</bundles_post_ra>
